<compile_context>
chip_gen: v6e
topology: v6e:2x2x1
jax: 0.10.0
libtpu: 0.0.40
codegen_flags: <defaults>
</compile_context>

<pallas_src>
import functools

import jax
import jax.numpy as jnp
from jax import lax
from jax.experimental import pallas as pl
from jax.experimental.pallas import tpu as pltpu

LEAKY_SLOPE = 0.1


def _round_up(x, m):
    return (x + m - 1) // m * m


# ----------------------------- Pallas kernel ---------------------------------
def _conv_kx1_kernel(x_ref, w_ref, b_ref, o_ref, *, K, stride, TH, apply_act):
    # x_ref: (Hp, C_in)  f32   full (padded) H extent for one (batch, period-pos) row
    # w_ref: (K, C_in, TCO) bf16
    # b_ref: (1, TCO)    f32
    # o_ref: (TH, TCO)   f32   one (H-tile, C_out-tile) output block
    base = pl.multiple_of(pl.program_id(2) * (TH * stride), 8)

    def tap(k):
        if stride == 1:
            xs = x_ref[pl.ds(base + k, TH), :]                     # (TH, C_in)
        else:
            xs = x_ref[pl.ds(base + k, TH, stride=stride), :]      # strided row gather
        return jnp.dot(xs.astype(jnp.bfloat16), w_ref[k],
                       preferred_element_type=jnp.float32)

    # Accumulate the K taps directly into the VMEM output block (MXU, f32 accumulation).
    o_ref[...] = tap(0)
    for k in range(1, K):          # K is 3 or 5 -> small static unroll
        o_ref[...] += tap(k)

    y = o_ref[...] + b_ref[...]    # single hoisted bias broadcast, f32
    if apply_act:
        y = jnp.where(y >= 0, y, LEAKY_SLOPE * y)
    o_ref[...] = y


def conv_kx1(x, w, b, *, stride, pad, apply_act, th_max=256, tco_max=256):
    """Conv2d with (K,1) kernel as a 1-D conv over H per (batch, period) row, + LeakyReLU."""
    BW, H_in, C_in = x.shape
    K, _, C_out = w.shape
    H_out = (H_in + 2 * pad - K) // stride + 1

    # Balanced H tiling; TH multiple of 8 so the output block is sublane-dense.
    n_h = pl.cdiv(H_out, th_max)
    TH = _round_up(pl.cdiv(H_out, n_h), 8)
    H_out_pad = n_h * TH

    # C_out tiling: 256-wide blocks for the big layers (matches v6e/v7x MXU), else full dim.
    TCO = tco_max if C_out % tco_max == 0 else C_out
    n_co = C_out // TCO

    # Zero-pad H once so every in-kernel tap read is in bounds (covers the conv's own zero
    # padding and the H_out -> H_out_pad tile round-up; extra rows are sliced off below).
    Hp = max((H_out_pad - 1) * stride + K, H_in + pad)
    x_p = jnp.pad(x, ((0, 0), (pad, Hp - pad - H_in), (0, 0)))

    kernel = functools.partial(_conv_kx1_kernel, K=K, stride=stride, TH=TH,
                               apply_act=apply_act)
    out = pl.pallas_call(
        kernel,
        out_shape=jax.ShapeDtypeStruct((BW, H_out_pad, C_out), jnp.float32),
        grid=(n_co, BW, n_h),
        in_specs=[
            # Full padded H per (batch, period) row; re-DMA'd only when bw changes.
            pl.BlockSpec((None, Hp, C_in), lambda co, bw, h: (bw, 0, 0)),
            # Weight tile; co is the slowest grid axis -> each weight tile is DMA'd once.
            pl.BlockSpec((K, C_in, TCO), lambda co, bw, h: (0, 0, co)),
            pl.BlockSpec((1, TCO), lambda co, bw, h: (0, co)),
        ],
        out_specs=pl.BlockSpec((None, TH, TCO), lambda co, bw, h: (bw, h, co)),
        compiler_params=pltpu.CompilerParams(
            dimension_semantics=("parallel", "parallel", "parallel"),
            vmem_limit_bytes=48 * 1024 * 1024),   # fits v7x's 64 MiB VMEM per TensorCore
    )(x_p, w.astype(jnp.bfloat16), b.reshape(1, -1).astype(jnp.float32))
    return out[:, :H_out, :]


# ------------------------- deterministic parameters --------------------------
def init_params(key):
    # (C_in, C_out, K, stride, pad) for the 5 conv layers + post_conv
    specs = [
        (1, 32, 5, 3, 2),
        (32, 128, 5, 3, 2),
        (128, 512, 5, 3, 2),
        (512, 1024, 5, 3, 2),
        (1024, 1024, 5, 1, 2),
        (1024, 1, 3, 1, 1),      # post_conv
    ]
    params = []
    for cin, cout, k, s, p in specs:
        key, kv, kg, kb = jax.random.split(key, 4)
        v = jax.random.normal(kv, (k, cin, cout), jnp.float32)
        g = 1.0 + 0.1 * jax.random.normal(kg, (cout,), jnp.float32)
        # weight_norm (torch default dim=0): normalize per output channel, scale by g.
        norm = jnp.sqrt(jnp.sum(v * v, axis=(0, 1), keepdims=True))
        w = v / norm * g[None, None, :]
        b = 0.01 * jax.random.normal(kb, (cout,), jnp.float32)
        params.append(dict(w=w, b=b, stride=s, pad=p))
    return params


# ------------------------------- forward pass ---------------------------------
def period_discriminator_forward(x, params, period):
    # x: (B, T) -> (post_conv flattened, concat of all flattened layer activations)
    B, T = x.shape
    if T % period:
        x = jnp.pad(x, ((0, 0), (0, period - T % period)), mode="reflect")
    channels = T // period + (1 if T % period else 0)
    # torch view: (B, 1, channels, period) NCHW.  Kernel layout: (B*period, H=channels, C=1).
    h = x.reshape(B, channels, period).transpose(0, 2, 1).reshape(B * period, channels, 1)
    acts = []
    n = len(params)
    for i, p in enumerate(params):
        h = conv_kx1(h, p["w"], p["b"], stride=p["stride"], pad=p["pad"],
                     apply_act=(i < n - 1))
        Hl, C = h.shape[1], h.shape[2]
        # (B*W, H, C) -> (B, C, H, W) -> flatten(1): matches PyTorch NCHW flatten ordering.
        acts.append(h.reshape(B, period, Hl, C).transpose(0, 3, 2, 1).reshape(B, -1))
    return acts[-1], jnp.concatenate(acts, axis=1)


# --------------------------- pure-JAX reference --------------------------------
def reference_forward(x, params, period, mxu_dtype=None):
    # mxu_dtype=jnp.bfloat16 simulates the kernel's bf16 MXU operands (f32 accumulation).
    B, T = x.shape
    if T % period:
        x = jnp.pad(x, ((0, 0), (0, period - T % period)), mode="reflect")
    channels = T // period + (1 if T % period else 0)
    h = x.reshape(B, 1, channels, period)              # NCHW, like torch
    acts = []
    for i, p in enumerate(params):
        w = jnp.transpose(p["w"], (2, 1, 0))[:, :, :, None]   # (Cout, Cin, K, 1)
        hin = h
        if mxu_dtype is not None:
            hin = hin.astype(mxu_dtype).astype(jnp.float32)
            w = w.astype(mxu_dtype).astype(jnp.float32)
        h = lax.conv_general_dilated(
            hin, w, window_strides=(p["stride"], 1),
            padding=((p["pad"], p["pad"]), (0, 0)),
            dimension_numbers=("NCHW", "OIHW", "NCHW"))
        h = h + p["b"][None, :, None, None]
        if i < len(params) - 1:
            h = jnp.where(h >= 0, h, LEAKY_SLOPE * h)
        acts.append(h.reshape(B, -1))
    return h.reshape(B, -1), jnp.concatenate(acts, axis=1)


if __name__ == "__main__":
    key = jax.random.PRNGKey(0)
    kx, kp = jax.random.split(key)

    # T % period != 0 exercises the reflect-pad path; layer-1 H_out = 267 exercises
    # multi-H-tile grids; layers 3-5 exercise C_out tiling (256-wide blocks).
    B, T, period = 2, 1601, 2
    x = jax.random.normal(kx, (B, T), jnp.float32)
    params = init_params(kp)

    out, feats = period_discriminator_forward(x, params, period)
    out, feats = jax.block_until_ready((out, feats))

    # Tight check vs a reference whose conv operands are rounded to bf16 (what the MXU sees).
    ref_out_bf, ref_feats_bf = reference_forward(x, params, period, mxu_dtype=jnp.bfloat16)
    assert out.shape == ref_out_bf.shape and feats.shape == ref_feats_bf.shape
    assert jnp.allclose(out, ref_out_bf, atol=2e-3, rtol=2e-3)
    assert jnp.allclose(feats, ref_feats_bf, atol=2e-3, rtol=2e-3)

    # Loose check vs the pure-f32 reference (bounds the bf16 MXU-operand rounding error).
    ref_out, ref_feats = reference_forward(x, params, period)
    assert jnp.allclose(out, ref_out, atol=5e-2, rtol=5e-2)
    assert jnp.allclose(feats, ref_feats, atol=5e-2, rtol=5e-2)

    print("KERNEL_OK")
</pallas_src>

<mosaic_0001>
module attributes {stable_mosaic.version = 11 : i64} {
  func.func @_conv_kx1_kernel(%arg0: i32, %arg1: i32, %arg2: i32, %arg3: memref<1x818x1xf32, #tpu.memory_space<vmem>>, %arg4: memref<5x1x32xbf16, #tpu.memory_space<vmem>>, %arg5: memref<1x32xf32, #tpu.memory_space<vmem>>, %arg6: memref<1x136x32xf32, #tpu.memory_space<vmem>>) attributes {dimension_semantics = [#tpu.dimension_semantics<parallel>, #tpu.dimension_semantics<parallel>, #tpu.dimension_semantics<parallel>], iteration_bounds = array<i64: 1, 4, 2>, scalar_prefetch = 0 : i64, scratch_operands = 0 : i64, tpu.core_type = #tpu.core_type<tc>, window_params = [{transform_indices = @transform_0, window_bounds = array<i64: 1, 818, 1>}, {transform_indices = @transform_1, window_bounds = array<i64: 5, 1, 32>}, {transform_indices = @transform_2, window_bounds = array<i64: 1, 32>}, {transform_indices = @transform_3, window_bounds = array<i64: 1, 136, 32>}]} {
    %c408_i32 = arith.constant 408 : i32
    %0 = arith.muli %arg2, %c408_i32 : i32
    %1 = tpu.assume_multiple %0, 8 : i32
    %c0_i32 = arith.constant 0 : i32
    %2 = arith.addi %1, %c0_i32 : i32
    %c0 = arith.constant 0 : index
    %3 = arith.index_cast %2 : i32 to index
    %c0_0 = arith.constant 0 : index
    %4 = tpu.strided_load %arg3[%c0, %3, %c0_0] {strides = array<i32: 1, 3, 1>} : memref<1x818x1xf32, #tpu.memory_space<vmem>>, vector<1x136x1xf32>
    %5 = vector.shape_cast %4 : vector<1x136x1xf32> to vector<136x1xf32>
    %6 = arith.truncf %5 : vector<136x1xf32> to vector<136x1xbf16>
    %c0_1 = arith.constant 0 : index
    %c0_2 = arith.constant 0 : index
    %c0_3 = arith.constant 0 : index
    %7 = vector.load %arg4[%c0_1, %c0_2, %c0_3] : memref<5x1x32xbf16, #tpu.memory_space<vmem>>, vector<1x1x32xbf16>
    %8 = vector.shape_cast %7 : vector<1x1x32xbf16> to vector<1x32xbf16>
    %cst = arith.constant dense<0.000000e+00> : vector<136x32xf32>
    %9 = tpu.matmul %6, %8, %cst {dimension_numbers = #tpu.dot_dimension_numbers<[1], [0], [0], [1], [0, 0, 1, 1], [], []>} : vector<136x1xbf16>, vector<1x32xbf16>, vector<136x32xf32> -> vector<136x32xf32>
    %c0_4 = arith.constant 0 : index
    %c0_5 = arith.constant 0 : index
    %c0_6 = arith.constant 0 : index
    %10 = vector.load %arg6[%c0_4, %c0_5, %c0_6] : memref<1x136x32xf32, #tpu.memory_space<vmem>>, vector<1x136x32xf32>
    %11 = vector.shape_cast %10 : vector<1x136x32xf32> to vector<136x32xf32>
    %12 = vector.shape_cast %9 : vector<136x32xf32> to vector<1x136x32xf32>
    tpu.vector_store %arg6[%c0_4, %c0_5, %c0_6], %12 {strides = array<i32>} : memref<1x136x32xf32, #tpu.memory_space<vmem>>, vector<1x136x32xf32>,
    %c0_7 = arith.constant 0 : index
    %c0_8 = arith.constant 0 : index
    %c0_9 = arith.constant 0 : index
    %13 = vector.load %arg6[%c0_7, %c0_8, %c0_9] : memref<1x136x32xf32, #tpu.memory_space<vmem>>, vector<1x136x32xf32>
    %14 = vector.shape_cast %13 : vector<1x136x32xf32> to vector<136x32xf32>
    %c1_i32 = arith.constant 1 : i32
    %15 = arith.addi %1, %c1_i32 : i32
    %c0_10 = arith.constant 0 : index
    %16 = arith.index_cast %15 : i32 to index
    %c0_11 = arith.constant 0 : index
    %17 = tpu.strided_load %arg3[%c0_10, %16, %c0_11] {strides = array<i32: 1, 3, 1>} : memref<1x818x1xf32, #tpu.memory_space<vmem>>, vector<1x136x1xf32>
    %18 = vector.shape_cast %17 : vector<1x136x1xf32> to vector<136x1xf32>
    %19 = arith.truncf %18 : vector<136x1xf32> to vector<136x1xbf16>
    %c1 = arith.constant 1 : index
    %c0_12 = arith.constant 0 : index
    %c0_13 = arith.constant 0 : index
    %20 = vector.load %arg4[%c1, %c0_12, %c0_13] : memref<5x1x32xbf16, #tpu.memory_space<vmem>>, vector<1x1x32xbf16>
    %21 = vector.shape_cast %20 : vector<1x1x32xbf16> to vector<1x32xbf16>
    %cst_14 = arith.constant dense<0.000000e+00> : vector<136x32xf32>
    %22 = tpu.matmul %19, %21, %cst_14 {dimension_numbers = #tpu.dot_dimension_numbers<[1], [0], [0], [1], [0, 0, 1, 1], [], []>} : vector<136x1xbf16>, vector<1x32xbf16>, vector<136x32xf32> -> vector<136x32xf32>
    %23 = arith.addf %14, %22 : vector<136x32xf32>
    %c0_15 = arith.constant 0 : index
    %c0_16 = arith.constant 0 : index
    %c0_17 = arith.constant 0 : index
    %24 = vector.load %arg6[%c0_15, %c0_16, %c0_17] : memref<1x136x32xf32, #tpu.memory_space<vmem>>, vector<1x136x32xf32>
    %25 = vector.shape_cast %24 : vector<1x136x32xf32> to vector<136x32xf32>
    %26 = vector.shape_cast %23 : vector<136x32xf32> to vector<1x136x32xf32>
    tpu.vector_store %arg6[%c0_15, %c0_16, %c0_17], %26 {strides = array<i32>} : memref<1x136x32xf32, #tpu.memory_space<vmem>>, vector<1x136x32xf32>,
    %c0_18 = arith.constant 0 : index
    %c0_19 = arith.constant 0 : index
    %c0_20 = arith.constant 0 : index
    %27 = vector.load %arg6[%c0_18, %c0_19, %c0_20] : memref<1x136x32xf32, #tpu.memory_space<vmem>>, vector<1x136x32xf32>
    %28 = vector.shape_cast %27 : vector<1x136x32xf32> to vector<136x32xf32>
    %c2_i32 = arith.constant 2 : i32
    %29 = arith.addi %1, %c2_i32 : i32
    %c0_21 = arith.constant 0 : index
    %30 = arith.index_cast %29 : i32 to index
    %c0_22 = arith.constant 0 : index
    %31 = tpu.strided_load %arg3[%c0_21, %30, %c0_22] {strides = array<i32: 1, 3, 1>} : memref<1x818x1xf32, #tpu.memory_space<vmem>>, vector<1x136x1xf32>
    %32 = vector.shape_cast %31 : vector<1x136x1xf32> to vector<136x1xf32>
    %33 = arith.truncf %32 : vector<136x1xf32> to vector<136x1xbf16>
    %c2 = arith.constant 2 : index
    %c0_23 = arith.constant 0 : index
    %c0_24 = arith.constant 0 : index
    %34 = vector.load %arg4[%c2, %c0_23, %c0_24] : memref<5x1x32xbf16, #tpu.memory_space<vmem>>, vector<1x1x32xbf16>
    %35 = vector.shape_cast %34 : vector<1x1x32xbf16> to vector<1x32xbf16>
    %cst_25 = arith.constant dense<0.000000e+00> : vector<136x32xf32>
    %36 = tpu.matmul %33, %35, %cst_25 {dimension_numbers = #tpu.dot_dimension_numbers<[1], [0], [0], [1], [0, 0, 1, 1], [], []>} : vector<136x1xbf16>, vector<1x32xbf16>, vector<136x32xf32> -> vector<136x32xf32>
    %37 = arith.addf %28, %36 : vector<136x32xf32>
    %c0_26 = arith.constant 0 : index
    %c0_27 = arith.constant 0 : index
    %c0_28 = arith.constant 0 : index
    %38 = vector.load %arg6[%c0_26, %c0_27, %c0_28] : memref<1x136x32xf32, #tpu.memory_space<vmem>>, vector<1x136x32xf32>
    %39 = vector.shape_cast %38 : vector<1x136x32xf32> to vector<136x32xf32>
    %40 = vector.shape_cast %37 : vector<136x32xf32> to vector<1x136x32xf32>
    tpu.vector_store %arg6[%c0_26, %c0_27, %c0_28], %40 {strides = array<i32>} : memref<1x136x32xf32, #tpu.memory_space<vmem>>, vector<1x136x32xf32>,
    %c0_29 = arith.constant 0 : index
    %c0_30 = arith.constant 0 : index
    %c0_31 = arith.constant 0 : index
    %41 = vector.load %arg6[%c0_29, %c0_30, %c0_31] : memref<1x136x32xf32, #tpu.memory_space<vmem>>, vector<1x136x32xf32>
    %42 = vector.shape_cast %41 : vector<1x136x32xf32> to vector<136x32xf32>
    %c3_i32 = arith.constant 3 : i32
    %43 = arith.addi %1, %c3_i32 : i32
    %c0_32 = arith.constant 0 : index
    %44 = arith.index_cast %43 : i32 to index
    %c0_33 = arith.constant 0 : index
    %45 = tpu.strided_load %arg3[%c0_32, %44, %c0_33] {strides = array<i32: 1, 3, 1>} : memref<1x818x1xf32, #tpu.memory_space<vmem>>, vector<1x136x1xf32>
    %46 = vector.shape_cast %45 : vector<1x136x1xf32> to vector<136x1xf32>
    %47 = arith.truncf %46 : vector<136x1xf32> to vector<136x1xbf16>
    %c3 = arith.constant 3 : index
    %c0_34 = arith.constant 0 : index
    %c0_35 = arith.constant 0 : index
    %48 = vector.load %arg4[%c3, %c0_34, %c0_35] : memref<5x1x32xbf16, #tpu.memory_space<vmem>>, vector<1x1x32xbf16>
    %49 = vector.shape_cast %48 : vector<1x1x32xbf16> to vector<1x32xbf16>
    %cst_36 = arith.constant dense<0.000000e+00> : vector<136x32xf32>
    %50 = tpu.matmul %47, %49, %cst_36 {dimension_numbers = #tpu.dot_dimension_numbers<[1], [0], [0], [1], [0, 0, 1, 1], [], []>} : vector<136x1xbf16>, vector<1x32xbf16>, vector<136x32xf32> -> vector<136x32xf32>
    %51 = arith.addf %42, %50 : vector<136x32xf32>
    %c0_37 = arith.constant 0 : index
    %c0_38 = arith.constant 0 : index
    %c0_39 = arith.constant 0 : index
    %52 = vector.load %arg6[%c0_37, %c0_38, %c0_39] : memref<1x136x32xf32, #tpu.memory_space<vmem>>, vector<1x136x32xf32>
    %53 = vector.shape_cast %52 : vector<1x136x32xf32> to vector<136x32xf32>
    %54 = vector.shape_cast %51 : vector<136x32xf32> to vector<1x136x32xf32>
    tpu.vector_store %arg6[%c0_37, %c0_38, %c0_39], %54 {strides = array<i32>} : memref<1x136x32xf32, #tpu.memory_space<vmem>>, vector<1x136x32xf32>,
    %c0_40 = arith.constant 0 : index
    %c0_41 = arith.constant 0 : index
    %c0_42 = arith.constant 0 : index
    %55 = vector.load %arg6[%c0_40, %c0_41, %c0_42] : memref<1x136x32xf32, #tpu.memory_space<vmem>>, vector<1x136x32xf32>
    %56 = vector.shape_cast %55 : vector<1x136x32xf32> to vector<136x32xf32>
    %c4_i32 = arith.constant 4 : i32
    %57 = arith.addi %1, %c4_i32 : i32
    %c0_43 = arith.constant 0 : index
    %58 = arith.index_cast %57 : i32 to index
    %c0_44 = arith.constant 0 : index
    %59 = tpu.strided_load %arg3[%c0_43, %58, %c0_44] {strides = array<i32: 1, 3, 1>} : memref<1x818x1xf32, #tpu.memory_space<vmem>>, vector<1x136x1xf32>
    %60 = vector.shape_cast %59 : vector<1x136x1xf32> to vector<136x1xf32>
    %61 = arith.truncf %60 : vector<136x1xf32> to vector<136x1xbf16>
    %c4 = arith.constant 4 : index
    %c0_45 = arith.constant 0 : index
    %c0_46 = arith.constant 0 : index
    %62 = vector.load %arg4[%c4, %c0_45, %c0_46] : memref<5x1x32xbf16, #tpu.memory_space<vmem>>, vector<1x1x32xbf16>
    %63 = vector.shape_cast %62 : vector<1x1x32xbf16> to vector<1x32xbf16>
    %cst_47 = arith.constant dense<0.000000e+00> : vector<136x32xf32>
    %64 = tpu.matmul %61, %63, %cst_47 {dimension_numbers = #tpu.dot_dimension_numbers<[1], [0], [0], [1], [0, 0, 1, 1], [], []>} : vector<136x1xbf16>, vector<1x32xbf16>, vector<136x32xf32> -> vector<136x32xf32>
    %65 = arith.addf %56, %64 : vector<136x32xf32>
    %c0_48 = arith.constant 0 : index
    %c0_49 = arith.constant 0 : index
    %c0_50 = arith.constant 0 : index
    %66 = vector.load %arg6[%c0_48, %c0_49, %c0_50] : memref<1x136x32xf32, #tpu.memory_space<vmem>>, vector<1x136x32xf32>
    %67 = vector.shape_cast %66 : vector<1x136x32xf32> to vector<136x32xf32>
    %68 = vector.shape_cast %65 : vector<136x32xf32> to vector<1x136x32xf32>
    tpu.vector_store %arg6[%c0_48, %c0_49, %c0_50], %68 {strides = array<i32>} : memref<1x136x32xf32, #tpu.memory_space<vmem>>, vector<1x136x32xf32>,
    %c0_51 = arith.constant 0 : index
    %c0_52 = arith.constant 0 : index
    %c0_53 = arith.constant 0 : index
    %69 = vector.load %arg6[%c0_51, %c0_52, %c0_53] : memref<1x136x32xf32, #tpu.memory_space<vmem>>, vector<1x136x32xf32>
    %70 = vector.shape_cast %69 : vector<1x136x32xf32> to vector<136x32xf32>
    %c0_54 = arith.constant 0 : index
    %c0_55 = arith.constant 0 : index
    %71 = vector.load %arg5[%c0_54, %c0_55] : memref<1x32xf32, #tpu.memory_space<vmem>>, vector<1x32xf32>
    %72 = vector.broadcast %71 : vector<1x32xf32> to vector<136x32xf32>
    %73 = arith.addf %70, %72 : vector<136x32xf32>
    %cst_56 = arith.constant 0.000000e+00 : f32
    %74 = vector.broadcast %cst_56 : f32 to vector<136x32xf32>
    %75 = arith.cmpf oge, %73, %74 : vector<136x32xf32>
    %cst_57 = arith.constant 1.000000e-01 : f32
    %76 = vector.broadcast %cst_57 : f32 to vector<136x32xf32>
    %77 = arith.mulf %76, %73 : vector<136x32xf32>
    %78 = arith.select %75, %73, %77 : vector<136x32xi1>, vector<136x32xf32>
    %c0_58 = arith.constant 0 : index
    %c0_59 = arith.constant 0 : index
    %c0_60 = arith.constant 0 : index
    %79 = vector.load %arg6[%c0_58, %c0_59, %c0_60] : memref<1x136x32xf32, #tpu.memory_space<vmem>>, vector<1x136x32xf32>
    %80 = vector.shape_cast %79 : vector<1x136x32xf32> to vector<136x32xf32>
    %81 = vector.shape_cast %78 : vector<136x32xf32> to vector<1x136x32xf32>
    tpu.vector_store %arg6[%c0_58, %c0_59, %c0_60], %81 {strides = array<i32>} : memref<1x136x32xf32, #tpu.memory_space<vmem>>, vector<1x136x32xf32>,
    return
  }
  func.func @transform_0(%arg0: i32, %arg1: i32, %arg2: i32) -> (i32, i32, i32) {
    %c0_i32 = arith.constant 0 : i32
    %c0_i32_0 = arith.constant 0 : i32
    %c0_i32_1 = arith.constant 0 : i32
    return %arg1, %c0_i32, %c0_i32_0 : i32, i32, i32
  }
  func.func @transform_1(%arg0: i32, %arg1: i32, %arg2: i32) -> (i32, i32, i32) {
    %c0_i32 = arith.constant 0 : i32
    %c0_i32_0 = arith.constant 0 : i32
    %c0_i32_1 = arith.constant 0 : i32
    return %c0_i32, %c0_i32_0, %arg0 : i32, i32, i32
  }
  func.func @transform_2(%arg0: i32, %arg1: i32, %arg2: i32) -> (i32, i32) {
    %c0_i32 = arith.constant 0 : i32
    %c0_i32_0 = arith.constant 0 : i32
    return %c0_i32, %arg0 : i32, i32
  }
  func.func @transform_3(%arg0: i32, %arg1: i32, %arg2: i32) -> (i32, i32, i32) {
    %c0_i32 = arith.constant 0 : i32
    return %arg1, %arg2, %arg0 : i32, i32, i32
  }
}

</mosaic_0001>

<bundles_post_ra>
// kernel: tpu_custom_call.1
= control target key start
LH: loop header
LB: loop body
LE: loop exit
PB: predicated region body
PF: predicated region fallthrough
CT: control target
= control target key end

     0   :  { %s2166_s12 = smov 0   ;;  %s2168_s13 = smov 0   ;;  %s2788_s0 = inlined_call_operand.vmem [shape: f32[4,818,1], index: 0, kind: input, shape index: {}]   ;;  %s2789_s1 = inlined_call_operand.vmem [shape: bf16[5,1,32], index: 1, kind: input, shape index: {}]   ;;  %s2790_s2 = inlined_call_operand.vmem [shape: f32[1,32], index: 2, kind: input, shape index: {}]   ;;  %s2791_s3 = inlined_call_operand.vmem [shape: f32[4,272,32], index: 3, kind: output, shape index: {}]  }
   0x1   :  { %s2170_s14 = smov 0   ;;  %s2172_s15 = smov 0  }
   0x2   :  { %s2174_s16 = smov 0  }
   0x3 LB: > { %s25_s17 = sadd.s32 1, %s2133_s14  ;;  %s28_s18 = sadd.s32 1, %s2137_s15  ;;  %s2141_s16 = sphi %s2174_s16, %s13_s16   ;;  %s2137_s15 = sphi %s2172_s15, %s2795_s15   ;;  %s2133_s14 = sphi %s2170_s14, %s2794_s14   ;;  %s2129_s13 = sphi %s2168_s13, %s2793_s13   ;;  %s2125_s12 = sphi %s2166_s12, %s2792_s12  }
   0x4   : > { %p26_p0 = scmp.ge.s32.totalorder %s25_s17, 2  ;;  %p1677_p1 = scmp.ge.s32.totalorder %s2141_s16, 1 }
   0x5   : > { %p176_p2 = scmp.lt.s32.totalorder %s2141_s16, 9 }
   0x6   : > { %s2797_s17 = smov (%p26_p0, %s25_s17), 0  ;;  %s2799_s18 = smov (!%p26_p0, %s28_s18), %s2137_s15 }
   0x7   : > { %p177_p3 = pnand %p1677_p1, %p176_p2  ;;  %p30_p4 = scmp.ge.s32.totalorder %s2799_s18, 4 }
   0x8   : > { %p213_p5 = scmp.lt.s32.totalorder (!%p177_p3), %s2129_s13, 3  ;;  %s238_s21 = smul.u32 (!%p177_p3), 408, %s2125_s12 }
   0x9   : > { %s2801_s18 = smov (%p30_p4, %s2799_s18), 0  ;;  %180 = sbr.rel (%p177_p3) target bundleno = 411 (0x19b), region = 32 }
   0xa   : > { %s224_s8 = smul.u32 (!%p177_p3), 17, %s2125_s12 }
   0xc   : > { %p227_p6 = scmp.lt.s32.totalorder (!%p177_p3), %s224_s8, 33 }
   0xe   : > { %v282_v0 = vld [vmem:[%s2789_s1] sm:$0x1]  ;;  %vm311_vm0 = vcmask 1040384   ;;  %v2143_v1 = vmov 0.0   ;;  %v2144_v2 = vmov 0   ;;  %vm2145_vm1 = vmmov 0  }
   0xf   : > { %2056 = vmatprep.subr.bf16.mxu1 %v2143_v1  ;;  %1866 = vmatprep.subr.bf16.mxu0 %v2143_v1  ;;  %v2203_v3 = vsel %vm311_vm0, 65535, %v2144_v2  ;;  %s2803_s13 = smov (!%p213_p5, %s2129_s13), 3  ;;  %v1749_v5 = vld [vmem:[%s2789_s1 + $0x2] sm:$0x1]  ;;  %v1722_v6 = vld [vmem:[%s2789_s1 + $0x1] sm:$0x1] }
  0x10   : > { %v315_v4 = vand.u32 %v2203_v3, %v282_v0  ;;  %1868 = vmatprep.mubr.msk.bf16.mxu0 %vm2145_vm1, %v2143_v1  ;;  %1888 = vmatprep.mubr.msk.bf16.mxu1 %vm2145_vm1, %v2143_v1  ;;  %s2058_s22 = smul.u32 824, %s2803_s13  ;;  %vm283_vm2 = vcmask 7168   ;;  %v761_v10 = vand.u32 %v1749_v5, %v2203_v3  ;;  %v530_v13 = vand.u32 %v1722_v6, %v2203_v3  ;;  %v1776_v36 = vld [vmem:[%s2789_s1 + $0x3] sm:$0x1]  ;;  %v1803_v44 = vld [vmem:[%s2789_s1 + $0x4] sm:$0x1] }
  0x11   : > { %v992_v39 = vand.u32 %v1776_v36, %v2203_v3  ;;  %v1223_v47 = vand.u32 %v1803_v44, %v2203_v3  ;;  %s2805_s8 = smov (!%p227_p6, %s224_s8), 33  ;;  %s2059_s9 = smul.u32 34, %s2803_s13  ;;  %vm421_vm3 = vcmask 261120  }
  0x12   : > { %2057 = vmatpush3.bf16.msra.mxu1 %v315_v4  ;;  %1867 = vmatpush3.bf16.msra.mxu0 %v315_v4  ;;  %s217_s27 = scalar_lea.vmem %s2788_s0, %s2058_s22 }
  0x13   : > { %1904 = vmatprep.subr.bf16.mxu1 %v2143_v1  ;;  %1942 = vmatprep.subr.bf16.mxu0 %v2143_v1  ;;  %s2225_s30 = scalar_lea.vmem %s217_s27, %s238_s21  ;;  %s233_s10 = sadd.s32 %s2059_s9, %s2805_s8 }
  0x14   : > { %v240_v7 = vld [vmem:[%s2225_s30] ss:$3 sm:$0xff]  ;;  %v1680_v8 = vld [vmem:[%s2225_s30 + $0x18] ss:$3 sm:$0xff]  ;;  %v1689_v9 = vld [vmem:[%s2225_s30 + $0xf0] ss:$3 sm:$0xff] }
  0x15   : > { %v273_v11 = vpack.c.bf16 %v1680_v8, %v240_v7  ;;  %v1690_v12 = vld [vmem:[%s2225_s30 + $0x108] ss:$3 sm:$0xff]  ;;  %v1681_v15 = vld [vmem:[%s2225_s30 + $0x30] ss:$3 sm:$0xff]  ;;  %v1691_v17 = vld [vmem:[%s2225_s30 + $0x120] ss:$3 sm:$0xff] }
  0x16   : > { %v278_v14 = vpack.c.bf16 %v1690_v12, %v1689_v9  ;;  %v1682_v16 = vld [vmem:[%s2225_s30 + $0x48] ss:$3 sm:$0xff]  ;;  %v1692_v18 = vld [vmem:[%s2225_s30 + $0x138] ss:$3 sm:$0xff]  ;;  %v1683_v21 = vld [vmem:[%s2225_s30 + $0x60] ss:$3 sm:$0xff] }
  0x17   : > { %1869 = vmatmul.mubr.msk.bf16.vlgmr.msra.gmra.mxu0 %vm283_vm2, %v273_v11  ;;  %v274_v19 = vpack.c.bf16 %v1682_v16, %v1681_v15  ;;  %v279_v20 = vpack.c.bf16 %v1692_v18, %v1691_v17  ;;  %v1684_v22 = vld [vmem:[%s2225_s30 + $0x78] ss:$3 sm:$0xff]  ;;  %v1693_v23 = vld [vmem:[%s2225_s30 + $0x150] ss:$3 sm:$0xff]  ;;  %v1694_v24 = vld [vmem:[%s2225_s30 + $0x168] ss:$3 sm:$0xff] }
  0x18   : > { %1889 = vmatmul.mubr.msk.bf16.vlgmr.msra.gmra.mxu1 %vm283_vm2, %v278_v14  ;;  %1943 = vmatpush3.bf16.msra.mxu0 %v761_v10  ;;  %v275_v25 = vpack.c.bf16 %v1684_v22, %v1683_v21  ;;  %v280_v26 = vpack.c.bf16 %v1694_v24, %v1693_v23  ;;  %v1685_v27 = vld [vmem:[%s2225_s30 + $0x90] ss:$3 sm:$0xff]  ;;  %v1686_v28 = vld [vmem:[%s2225_s30 + $0xa8] ss:$3 sm:$0xff]  ;;  %v1695_v29 = vld [vmem:[%s2225_s30 + $0x180] ss:$3 sm:$0xff] }
  0x19   : > { %1905 = vmatpush3.bf16.msra.mxu1 %v530_v13  ;;  %1872 = vmatprep.mubr.msk.bf16.mxu0 %vm2145_vm1, %v2143_v1  ;;  %v276_v30 = vpack.c.bf16 %v1686_v28, %v1685_v27  ;;  %v281_v31 = vpack.c.bf16 %v1695_v29, %v1695_v29  ;;  %v1687_v32 = vld [vmem:[%s2225_s30 + $0xc0] ss:$3 sm:$0xff]  ;;  %v1688_v33 = vld [vmem:[%s2225_s30 + $0xd8] ss:$3 sm:$0xff]  ;;  %v1706_v35 = vld [vmem:[%s2225_s30 + $0x19] ss:$3 sm:$0xff] }
  0x1a   : > { %1892 = vmatprep.mubr.msk.bf16.mxu1 %vm2145_vm1, %v2143_v1  ;;  %1980 = vmatprep.subr.bf16.mxu1 %v2143_v1  ;;  %v1705_v34 = vld [vmem:[%s2225_s30 + $0x1] ss:$3 sm:$0xff]  ;;  %v277_v37 = vpack.c.bf16 %v1688_v33, %v1687_v32  ;;  %v1732_v40 = vld [vmem:[%s2225_s30 + $0x2] ss:$3 sm:$0xff]  ;;  %v1733_v41 = vld [vmem:[%s2225_s30 + $0x1a] ss:$3 sm:$0xff] }
  0x1b   : > { %2018 = vmatprep.subr.bf16.mxu0 %v2143_v1  ;;  %v491_v38 = vpack.c.bf16 %v1706_v35, %v1705_v34  ;;  %v1707_v42 = vld [vmem:[%s2225_s30 + $0x31] ss:$3 sm:$0xff]  ;;  %v1708_v43 = vld [vmem:[%s2225_s30 + $0x49] ss:$3 sm:$0xff]  ;;  %v722_v45 = vpack.c.bf16 %v1733_v41, %v1732_v40  ;;  %v1735_v49 = vld [vmem:[%s2225_s30 + $0x4a] ss:$3 sm:$0xff] }
  0x1c   : > { %v492_v46 = vpack.c.bf16 %v1708_v43, %v1707_v42  ;;  %v1734_v48 = vld [vmem:[%s2225_s30 + $0x32] ss:$3 sm:$0xff]  ;;  %v1710_v51 = vld [vmem:[%s2225_s30 + $0x79] ss:$3 sm:$0xff]  ;;  %v1737_v55 = vld [vmem:[%s2225_s30 + $0x7a] ss:$3 sm:$0xff] }
  0x1d   : > { %v1709_v50 = vld [vmem:[%s2225_s30 + $0x61] ss:$3 sm:$0xff]  ;;  %v723_v52 = vpack.c.bf16 %v1735_v49, %v1734_v48  ;;  %v1736_v54 = vld [vmem:[%s2225_s30 + $0x62] ss:$3 sm:$0xff]  ;;  %v1712_v57 = vld [vmem:[%s2225_s30 + $0xa9] ss:$3 sm:$0xff] }
  0x1e   : > { %v493_v53 = vpack.c.bf16 %v1710_v51, %v1709_v50  ;;  %v1711_v56 = vld [vmem:[%s2225_s30 + $0x91] ss:$3 sm:$0xff]  ;;  %v724_v58 = vpack.c.bf16 %v1737_v55, %v1736_v54  ;;  %v1738_v60 = vld [vmem:[%s2225_s30 + $0x92] ss:$3 sm:$0xff]  ;;  %v1739_v61 = vld [vmem:[%s2225_s30 + $0xaa] ss:$3 sm:$0xff] }
  0x1f   : > { %1873 = vmatmul.mubr.msk.bf16.gmra.mxu0 %vm283_vm2, %v274_v19  ;;  %v494_v59 = vpack.c.bf16 %v1712_v57, %v1711_v56  ;;  %v1713_v62 = vld [vmem:[%s2225_s30 + $0xc1] ss:$3 sm:$0xff]  ;;  %v1714_v63 = vld [vmem:[%s2225_s30 + $0xd9] ss:$3 sm:$0xff]  ;;  %v725_v0 = vpack.c.bf16 %v1739_v61, %v1738_v60  ;;  %v1741_v4 = vld [vmem:[%s2225_s30 + $0xda] ss:$3 sm:$0xff] }
  0x20   : > { %1893 = vmatmul.mubr.msk.bf16.gmra.mxu1 %vm283_vm2, %v279_v20  ;;  %1876 = vmatprep.mubr.msk.bf16.mxu0 %vm2145_vm1, %v2143_v1  ;;  %v495_v2 = vpack.c.bf16 %v1714_v63, %v1713_v62  ;;  %v1740_v3 = vld [vmem:[%s2225_s30 + $0xc2] ss:$3 sm:$0xff]  ;;  %v1716_v6 = vld [vmem:[%s2225_s30 + $0x109] ss:$3 sm:$0xff]  ;;  %v1743_v10 = vld [vmem:[%s2225_s30 + $0x10a] ss:$3 sm:$0xff] }
  0x21   : > { %1896 = vmatprep.mubr.msk.bf16.mxu1 %vm2145_vm1, %v2143_v1  ;;  %v1715_v5 = vld [vmem:[%s2225_s30 + $0xf1] ss:$3 sm:$0xff]  ;;  %v726_v7 = vpack.c.bf16 %v1741_v4, %v1740_v3  ;;  %v1742_v9 = vld [vmem:[%s2225_s30 + $0xf2] ss:$3 sm:$0xff]  ;;  %v1718_v12 = vld [vmem:[%s2225_s30 + $0x139] ss:$3 sm:$0xff] }
  0x22   : > { %v496_v8 = vpack.c.bf16 %v1716_v6, %v1715_v5  ;;  %v1717_v11 = vld [vmem:[%s2225_s30 + $0x121] ss:$3 sm:$0xff]  ;;  %v727_v13 = vpack.c.bf16 %v1743_v10, %v1742_v9  ;;  %v1744_v15 = vld [vmem:[%s2225_s30 + $0x122] ss:$3 sm:$0xff]  ;;  %v1745_v16 = vld [vmem:[%s2225_s30 + $0x13a] ss:$3 sm:$0xff] }
  0x23   : > { %v497_v14 = vpack.c.bf16 %v1718_v12, %v1717_v11  ;;  %v1719_v17 = vld [vmem:[%s2225_s30 + $0x151] ss:$3 sm:$0xff]  ;;  %v1720_v18 = vld [vmem:[%s2225_s30 + $0x169] ss:$3 sm:$0xff]  ;;  %v728_v19 = vpack.c.bf16 %v1745_v16, %v1744_v15  ;;  %v1747_v22 = vld [vmem:[%s2225_s30 + $0x16a] ss:$3 sm:$0xff] }
  0x24   : > { %v498_v20 = vpack.c.bf16 %v1720_v18, %v1719_v17  ;;  %v1746_v21 = vld [vmem:[%s2225_s30 + $0x152] ss:$3 sm:$0xff]  ;;  %v1787_v32 = vld [vmem:[%s2225_s30 + $0x1c] ss:$3 sm:$0xff]  ;;  %v1792_v49 = vld [vmem:[%s2225_s30 + $0x94] ss:$3 sm:$0xff] }
  0x25   : > { %v1721_v23 = vld [vmem:[%s2225_s30 + $0x181] ss:$3 sm:$0xff]  ;;  %v729_v24 = vpack.c.bf16 %v1747_v22, %v1746_v21  ;;  %v1759_v27 = vld [vmem:[%s2225_s30 + $0x3] ss:$3 sm:$0xff]  ;;  %v1762_v34 = vld [vmem:[%s2225_s30 + $0x4b] ss:$3 sm:$0xff] }
  0x26   : > { %v1760_v28 = vld [vmem:[%s2225_s30 + $0x1b] ss:$3 sm:$0xff]  ;;  %v1761_v33 = vld [vmem:[%s2225_s30 + $0x33] ss:$3 sm:$0xff]  ;;  %v1767_v51 = vld [vmem:[%s2225_s30 + $0xc3] ss:$3 sm:$0xff] }
  0x27   : > { %1877 = vmatmul.mubr.msk.bf16.gmra.mxu0 %vm283_vm2, %v275_v25  ;;  %v499_v25 = vpack.c.bf16 %v1721_v23, %v1721_v23  ;;  %v954_v36 = vpack.c.bf16 %v1762_v34, %v1761_v33  ;;  %v1764_v40 = vld [vmem:[%s2225_s30 + $0x7b] ss:$3 sm:$0xff]  ;;  %v1791_v44 = vld [vmem:[%s2225_s30 + $0x7c] ss:$3 sm:$0xff]  ;;  %v1796_v61 = vld [vmem:[%s2225_s30 + $0xf4] ss:$3 sm:$0xff] }
  0x28   : > { %1897 = vmatmul.mubr.msk.bf16.gmra.mxu1 %vm283_vm2, %v280_v26  ;;  %1880 = vmatprep.mubr.msk.bf16.mxu0 %vm2145_vm1, %v2143_v1  ;;  %v1748_v26 = vld [vmem:[%s2225_s30 + $0x182] ss:$3 sm:$0xff]  ;;  %v1790_v43 = vld [vmem:[%s2225_s30 + $0x64] ss:$3 sm:$0xff]  ;;  %v1793_v50 = vld [vmem:[%s2225_s30 + $0xac] ss:$3 sm:$0xff] }
  0x29   : > { %1900 = vmatprep.mubr.msk.bf16.mxu1 %vm2145_vm1, %v2143_v1  ;;  %v730_v29 = vpack.c.bf16 %v1748_v26, %v1748_v26  ;;  %v1794_v55 = vld [vmem:[%s2225_s30 + $0xc4] ss:$3 sm:$0xff]  ;;  %v1795_v56 = vld [vmem:[%s2225_s30 + $0xdc] ss:$3 sm:$0xff]  ;;  %v1797_v62 = vld [vmem:[%s2225_s30 + $0x10c] ss:$3 sm:$0xff] }
  0x2a   : > { %v1769_v57 = vld [vmem:[%s2225_s30 + $0xf3] ss:$3 sm:$0xff]  ;;  %v1771_v63 = vld [vmem:[%s2225_s30 + $0x123] ss:$3 sm:$0xff]  ;;  %s1679_s11 = sshll.u32 %s233_s10, 3 }
  0x2b   : > { %v1798_v4 = vld [vmem:[%s2225_s30 + $0x124] ss:$3 sm:$0xff]  ;;  %v1799_v5 = vld [vmem:[%s2225_s30 + $0x13c] ss:$3 sm:$0xff]  ;;  %v1800_v10 = vld [vmem:[%s2225_s30 + $0x154] ss:$3 sm:$0xff]  ;;  %s2460_s21 = scalar_lea.vmem %s2791_s3, %s1679_s11 }
  0x2c   : > { %v1773_v6 = vld [vmem:[%s2225_s30 + $0x153] ss:$3 sm:$0xff]  ;;  %v1801_v11 = vld [vmem:[%s2225_s30 + $0x16c] ss:$3 sm:$0xff] }
  0x2d   : > { %v1775_v12 = vld [vmem:[%s2225_s30 + $0x183] ss:$3 sm:$0xff]  ;;  %v1802_v15 = vld [vmem:[%s2225_s30 + $0x184] ss:$3 sm:$0xff] }
  0x2e   : > { %v1192_v16 = vpack.c.bf16 %v1802_v15, %v1802_v15 }
  0x2f   : > { %1881 = vmatmul.mubr.msk.bf16.gmra.mxu0 %vm283_vm2, %v276_v30  ;;  %v953_v30 = vpack.c.bf16 %v1760_v28, %v1759_v27 }
  0x30   : > { %1901 = vmatmul.mubr.msk.bf16.gmra.mxu1 %vm283_vm2, %v281_v31  ;;  %1884 = vmatprep.mubr.msk.bf16.mxu0 %vm2145_vm1, %v2143_v1  ;;  %v1786_v31 = vld [vmem:[%s2225_s30 + $0x4] ss:$3 sm:$0xff] }
  0x31   : > { %1906 = vmatprep.mubr.msk.bf16.mxu1 %vm2145_vm1, %v2143_v1  ;;  %v1184_v35 = vpack.c.bf16 %v1787_v32, %v1786_v31 }
  0x37   : > { %1885 = vmatmul.mubr.msk.bf16.gmra.mxu0 %vm283_vm2, %v277_v37  ;;  %v1788_v37 = vld [vmem:[%s2225_s30 + $0x34] ss:$3 sm:$0xff] }
  0x38   : > { %1907 = vmatmul.mubr.msk.bf16.vlgmr.msra.gmra.mxu1 %vm283_vm2, %v491_v38  ;;  %1944 = vmatprep.mubr.msk.bf16.mxu0 %vm2145_vm1, %v2143_v1  ;;  %v1789_v38 = vld [vmem:[%s2225_s30 + $0x4c] ss:$3 sm:$0xff] }
  0x39   : > { %1981 = vmatpush3.bf16.msra.mxu1 %v992_v39  ;;  %1910 = vmatprep.mubr.msk.bf16.mxu1 %vm2145_vm1, %v2143_v1  ;;  %v1763_v39 = vld [vmem:[%s2225_s30 + $0x63] ss:$3 sm:$0xff]  ;;  %v1185_v41 = vpack.c.bf16 %v1789_v38, %v1788_v37 }
  0x3a   : > { %v955_v42 = vpack.c.bf16 %v1764_v40, %v1763_v39 }
  0x3f   : > { %1945 = vmatmul.mubr.msk.bf16.vlgmr.msra.gmra.mxu0 %vm283_vm2, %v722_v45  ;;  %v1765_v45 = vld [vmem:[%s2225_s30 + $0x93] ss:$3 sm:$0xff] }
  0x40   : > { %1911 = vmatmul.mubr.msk.bf16.gmra.mxu1 %vm283_vm2, %v492_v46  ;;  %2019 = vmatpush3.bf16.msra.mxu0 %v1223_v47  ;;  %v1766_v46 = vld [vmem:[%s2225_s30 + $0xab] ss:$3 sm:$0xff]  ;;  %v1186_v47 = vpack.c.bf16 %v1791_v44, %v1790_v43 }
  0x41   : > { %1914 = vmatprep.mubr.msk.bf16.mxu1 %vm2145_vm1, %v2143_v1  ;;  %1948 = vmatprep.mubr.msk.bf16.mxu0 %vm2145_vm1, %v2143_v1  ;;  %v956_v48 = vpack.c.bf16 %v1766_v46, %v1765_v45 }
  0x47   : > { %1949 = vmatmul.mubr.msk.bf16.gmra.mxu0 %vm283_vm2, %v723_v52  ;;  %v1768_v52 = vld [vmem:[%s2225_s30 + $0xdb] ss:$3 sm:$0xff] }
  0x48   : > { %1915 = vmatmul.mubr.msk.bf16.gmra.mxu1 %vm283_vm2, %v493_v53  ;;  %1952 = vmatprep.mubr.msk.bf16.mxu0 %vm2145_vm1, %v2143_v1  ;;  %v1187_v53 = vpack.c.bf16 %v1793_v50, %v1792_v49  ;;  %v957_v54 = vpack.c.bf16 %v1768_v52, %v1767_v51 }
  0x49   : > { %1918 = vmatprep.mubr.msk.bf16.mxu1 %vm2145_vm1, %v2143_v1 }
  0x4f   : > { %1953 = vmatmul.mubr.msk.bf16.gmra.mxu0 %vm283_vm2, %v724_v58  ;;  %v1770_v58 = vld [vmem:[%s2225_s30 + $0x10b] ss:$3 sm:$0xff] }
  0x50   : > { %1919 = vmatmul.mubr.msk.bf16.gmra.mxu1 %vm283_vm2, %v494_v59  ;;  %1956 = vmatprep.mubr.msk.bf16.mxu0 %vm2145_vm1, %v2143_v1  ;;  %v1188_v59 = vpack.c.bf16 %v1795_v56, %v1794_v55  ;;  %v958_v60 = vpack.c.bf16 %v1770_v58, %v1769_v57 }
  0x51   : > { %1922 = vmatprep.mubr.msk.bf16.mxu1 %vm2145_vm1, %v2143_v1 }
  0x57   : > { %1957 = vmatmul.mubr.msk.bf16.gmra.mxu0 %vm283_vm2, %v725_v0  ;;  %v1772_v0 = vld [vmem:[%s2225_s30 + $0x13b] ss:$3 sm:$0xff] }
  0x58   : > { %1923 = vmatmul.mubr.msk.bf16.gmra.mxu1 %vm283_vm2, %v495_v2  ;;  %1960 = vmatprep.mubr.msk.bf16.mxu0 %vm2145_vm1, %v2143_v1  ;;  %v1189_v2 = vpack.c.bf16 %v1797_v62, %v1796_v61  ;;  %v959_v3 = vpack.c.bf16 %v1772_v0, %v1771_v63 }
  0x59   : > { %1926 = vmatprep.mubr.msk.bf16.mxu1 %vm2145_vm1, %v2143_v1 }
  0x5f   : > { %1961 = vmatmul.mubr.msk.bf16.gmra.mxu0 %vm283_vm2, %v726_v7  ;;  %v1774_v7 = vld [vmem:[%s2225_s30 + $0x16b] ss:$3 sm:$0xff] }
  0x60   : > { %1927 = vmatmul.mubr.msk.bf16.gmra.mxu1 %vm283_vm2, %v496_v8  ;;  %1964 = vmatprep.mubr.msk.bf16.mxu0 %vm2145_vm1, %v2143_v1  ;;  %v1190_v8 = vpack.c.bf16 %v1799_v5, %v1798_v4  ;;  %v960_v9 = vpack.c.bf16 %v1774_v7, %v1773_v6 }
  0x61   : > { %1930 = vmatprep.mubr.msk.bf16.mxu1 %vm2145_vm1, %v2143_v1 }
  0x67   : > { %1965 = vmatmul.mubr.msk.bf16.gmra.mxu0 %vm283_vm2, %v727_v13  ;;  %v1191_v13 = vpack.c.bf16 %v1801_v11, %v1800_v10 }
  0x68   : > { %1931 = vmatmul.mubr.msk.bf16.gmra.mxu1 %vm283_vm2, %v497_v14  ;;  %1968 = vmatprep.mubr.msk.bf16.mxu0 %vm2145_vm1, %v2143_v1  ;;  %v961_v14 = vpack.c.bf16 %v1775_v12, %v1775_v12 }
  0x69   : > { %1934 = vmatprep.mubr.msk.bf16.mxu1 %vm2145_vm1, %v2143_v1 }
  0x6f   : > { %1969 = vmatmul.mubr.msk.bf16.gmra.mxu0 %vm283_vm2, %v728_v19 }
  0x70   : > { %1935 = vmatmul.mubr.msk.bf16.gmra.mxu1 %vm283_vm2, %v498_v20  ;;  %1972 = vmatprep.mubr.msk.bf16.mxu0 %vm2145_vm1, %v2143_v1 }
  0x71   : > { %1938 = vmatprep.mubr.msk.bf16.mxu1 %vm2145_vm1, %v2143_v1 }
  0x77   : > { %1973 = vmatmul.mubr.msk.bf16.gmra.mxu0 %vm283_vm2, %v729_v24 }
  0x78   : > { %1939 = vmatmul.mubr.msk.bf16.gmra.mxu1 %vm283_vm2, %v499_v25  ;;  %1976 = vmatprep.mubr.msk.bf16.mxu0 %vm2145_vm1, %v2143_v1 }
  0x79   : > { %1982 = vmatprep.mubr.msk.bf16.mxu1 %vm2145_vm1, %v2143_v1 }
  0x7f   : > { %1977 = vmatmul.mubr.msk.bf16.gmra.mxu0 %vm283_vm2, %v730_v29 }
  0x80   : > { %1983 = vmatmul.mubr.msk.bf16.vlgmr.msra.gmra.mxu1 %vm283_vm2, %v953_v30  ;;  %2020 = vmatprep.mubr.msk.bf16.mxu0 %vm2145_vm1, %v2143_v1 }
  0x81   : > { %1986 = vmatprep.mubr.msk.bf16.mxu1 %vm2145_vm1, %v2143_v1 }
  0x87   : > { %2021 = vmatmul.mubr.msk.bf16.vlgmr.msra.gmra.mxu0 %vm283_vm2, %v1184_v35 }
  0x88   : > { %1987 = vmatmul.mubr.msk.bf16.gmra.mxu1 %vm283_vm2, %v954_v36  ;;  %2024 = vmatprep.mubr.msk.bf16.mxu0 %vm2145_vm1, %v2143_v1 }
  0x89   : > { %1990 = vmatprep.mubr.msk.bf16.mxu1 %vm2145_vm1, %v2143_v1 }
  0x8f   : > { %2025 = vmatmul.mubr.msk.bf16.gmra.mxu0 %vm283_vm2, %v1185_v41 }
  0x90   : > { %1991 = vmatmul.mubr.msk.bf16.gmra.mxu1 %vm283_vm2, %v955_v42  ;;  %2028 = vmatprep.mubr.msk.bf16.mxu0 %vm2145_vm1, %v2143_v1 }
  0x91   : > { %1994 = vmatprep.mubr.msk.bf16.mxu1 %vm2145_vm1, %v2143_v1 }
  0x97   : > { %2029 = vmatmul.mubr.msk.bf16.gmra.mxu0 %vm283_vm2, %v1186_v47 }
  0x98   : > { %1995 = vmatmul.mubr.msk.bf16.gmra.mxu1 %vm283_vm2, %v956_v48  ;;  %2032 = vmatprep.mubr.msk.bf16.mxu0 %vm2145_vm1, %v2143_v1 }
  0x99   : > { %1998 = vmatprep.mubr.msk.bf16.mxu1 %vm2145_vm1, %v2143_v1 }
  0x9f   : > { %2033 = vmatmul.mubr.msk.bf16.gmra.mxu0 %vm283_vm2, %v1187_v53 }
  0xa0   : > { %1999 = vmatmul.mubr.msk.bf16.gmra.mxu1 %vm283_vm2, %v957_v54  ;;  %2036 = vmatprep.mubr.msk.bf16.mxu0 %vm2145_vm1, %v2143_v1 }
  0xa1   : > { %2002 = vmatprep.mubr.msk.bf16.mxu1 %vm2145_vm1, %v2143_v1 }
  0xa7   : > { %2037 = vmatmul.mubr.msk.bf16.gmra.mxu0 %vm283_vm2, %v1188_v59 }
  0xa8   : > { %2003 = vmatmul.mubr.msk.bf16.gmra.mxu1 %vm283_vm2, %v958_v60  ;;  %2040 = vmatprep.mubr.msk.bf16.mxu0 %vm2145_vm1, %v2143_v1 }
  0xa9   : > { %2006 = vmatprep.mubr.msk.bf16.mxu1 %vm2145_vm1, %v2143_v1 }
  0xaf   : > { %2041 = vmatmul.mubr.msk.bf16.gmra.mxu0 %vm283_vm2, %v1189_v2 }
  0xb0   : > { %2007 = vmatmul.mubr.msk.bf16.gmra.mxu1 %vm283_vm2, %v959_v3  ;;  %2044 = vmatprep.mubr.msk.bf16.mxu0 %vm2145_vm1, %v2143_v1 }
  0xb1   : > { %2010 = vmatprep.mubr.msk.bf16.mxu1 %vm2145_vm1, %v2143_v1 }
  0xb7   : > { %2045 = vmatmul.mubr.msk.bf16.gmra.mxu0 %vm283_vm2, %v1190_v8 }
  0xb8   : > { %2011 = vmatmul.mubr.msk.bf16.gmra.mxu1 %vm283_vm2, %v960_v9  ;;  %2048 = vmatprep.mubr.msk.bf16.mxu0 %vm2145_vm1, %v2143_v1 }
  0xb9   : > { %2014 = vmatprep.mubr.msk.bf16.mxu1 %vm2145_vm1, %v2143_v1 }
  0xbf   : > { %2049 = vmatmul.mubr.msk.bf16.gmra.mxu0 %vm283_vm2, %v1191_v13 }
  0xc0   : > { %2015 = vmatmul.mubr.msk.bf16.gmra.mxu1 %vm283_vm2, %v961_v14  ;;  %2052 = vmatprep.mubr.msk.bf16.mxu0 %vm2145_vm1, %v2143_v1 }
  0xc7   : > { %2053 = vmatmul.mubr.msk.bf16.gmra.mxu0 %vm283_vm2, %v1192_v16 }
  0xd7   : > { %v351_v1 = vpop.f32.mrf.mxu0 }
  0xd8   : > { %422 = vst.msk [vmem:[%s2460_s21] sm:$0xff] %vm421_vm3, %v351_v1  ;;  %v391_v17 = vpop.f32.mrf.mxu1 }
  0xd9   : > { %432 = vst.msk [vmem:[%s2460_s21 + $0x50] sm:$0xff] %vm421_vm3, %v391_v17  ;;  %v1870_v18 = vpop.f32.mrf.mxu0 }
  0xda   : > { %v1890_v19 = vpop.f32.mrf.mxu1 }
  0xdb   : > { %v354_v20 = vpop.f32.mrf.mxu0 }
  0xdc   : > { %423 = vst.msk [vmem:[%s2460_s21 + $0x8] sm:$0xff] %vm421_vm3, %v354_v20  ;;  %v394_v21 = vpop.f32.mrf.mxu1 }
  0xdd   : > { %433 = vst.msk [vmem:[%s2460_s21 + $0x58] sm:$0xff] %vm421_vm3, %v394_v21  ;;  %v1871_v22 = vpop.f32.mrf.mxu0 }
  0xde   : > { %v1891_v23 = vpop.f32.mrf.mxu1 }
  0xdf   : > { %v359_v24 = vpop.f32.mrf.mxu0  ;;  %v439_v49 = vld [vmem:[%s2460_s21] sm:$0xff] }
  0xe0   : > { %424 = vst.msk [vmem:[%s2460_s21 + $0x10] sm:$0xff] %vm421_vm3, %v359_v24  ;;  %v399_v25 = vpop.f32.mrf.mxu1 }
  0xe1   : > { %434 = vst.msk [vmem:[%s2460_s21 + $0x60] sm:$0xff] %vm421_vm3, %v399_v25  ;;  %v1874_v26 = vpop.f32.mrf.mxu0 }
  0xe2   : > { %v1894_v27 = vpop.f32.mrf.mxu1 }
  0xe3   : > { %v362_v28 = vpop.f32.mrf.mxu0  ;;  %v440_v55 = vld [vmem:[%s2460_s21 + $0x8] sm:$0xff] }
  0xe4   : > { %425 = vst.msk [vmem:[%s2460_s21 + $0x18] sm:$0xff] %vm421_vm3, %v362_v28  ;;  %v402_v29 = vpop.f32.mrf.mxu1 }
  0xe5   : > { %435 = vst.msk [vmem:[%s2460_s21 + $0x68] sm:$0xff] %vm421_vm3, %v402_v29  ;;  %v1875_v30 = vpop.f32.mrf.mxu0 }
  0xe6   : > { %v1895_v31 = vpop.f32.mrf.mxu1 }
  0xe7   : > { %v367_v32 = vpop.f32.mrf.mxu0  ;;  %v441_v61 = vld [vmem:[%s2460_s21 + $0x10] sm:$0xff] }
  0xe8   : > { %426 = vst.msk [vmem:[%s2460_s21 + $0x20] sm:$0xff] %vm421_vm3, %v367_v32  ;;  %v407_v33 = vpop.f32.mrf.mxu1 }
  0xe9   : > { %436 = vst.msk [vmem:[%s2460_s21 + $0x70] sm:$0xff] %vm421_vm3, %v407_v33  ;;  %v1878_v34 = vpop.f32.mrf.mxu0 }
  0xea   : > { %v1898_v35 = vpop.f32.mrf.mxu1 }
  0xeb   : > { %v370_v36 = vpop.f32.mrf.mxu0  ;;  %v442_v6 = vld [vmem:[%s2460_s21 + $0x18] sm:$0xff] }
  0xec   : > { %427 = vst.msk [vmem:[%s2460_s21 + $0x28] sm:$0xff] %vm421_vm3, %v370_v36  ;;  %v410_v37 = vpop.f32.mrf.mxu1 }
  0xed   : > { %437 = vst.msk [vmem:[%s2460_s21 + $0x78] sm:$0xff] %vm421_vm3, %v410_v37  ;;  %v1879_v38 = vpop.f32.mrf.mxu0 }
  0xee   : > { %v1899_v39 = vpop.f32.mrf.mxu1 }
  0xef   : > { %v375_v40 = vpop.f32.mrf.mxu0  ;;  %v443_v14 = vld [vmem:[%s2460_s21 + $0x20] sm:$0xff] }
  0xf0   : > { %428 = vst.msk [vmem:[%s2460_s21 + $0x30] sm:$0xff] %vm421_vm3, %v375_v40  ;;  %v415_v41 = vpop.f32.mrf.mxu1 }
  0xf1   : > { %438 = vst.msk [vmem:[%s2460_s21 + $0x80] sm:$0xff] %vm421_vm3, %v415_v41  ;;  %v1882_v42 = vpop.f32.mrf.mxu0 }
  0xf2   : > { %v1902_v43 = vpop.f32.mrf.mxu1 }
  0xf3   : > { %v378_v44 = vpop.f32.mrf.mxu0  ;;  %v444_v21 = vld [vmem:[%s2460_s21 + $0x28] sm:$0xff] }
  0xf4   : > { %429 = vst.msk [vmem:[%s2460_s21 + $0x38] sm:$0xff] %vm421_vm3, %v378_v44  ;;  %v418_v45 = vpop.f32.mrf.mxu1 }
  0xf5   : > { %v1883_v46 = vpop.f32.mrf.mxu0 }
  0xf6   : > { %v1903_v47 = vpop.f32.mrf.mxu1 }
  0xf7   : > { %v383_v48 = vpop.f32.mrf.mxu0  ;;  %v445_v29 = vld [vmem:[%s2460_s21 + $0x30] sm:$0xff] }
  0xf8   : > { %430 = vst.msk [vmem:[%s2460_s21 + $0x40] sm:$0xff] %vm421_vm3, %v383_v48  ;;  %v566_v50 = vpop.f32.mrf.mxu1 }
  0xf9   : > { %v636_v51 = vadd.f32 %v566_v50, %v439_v49  ;;  %v1886_v52 = vpop.f32.mrf.mxu0 }
  0xfa   : > { %v1908_v53 = vpop.f32.mrf.mxu1 }
  0xfb   : > { %653 = vst.msk [vmem:[%s2460_s21] sm:$0xff] %vm421_vm3, %v636_v51  ;;  %v386_v54 = vpop.f32.mrf.mxu0  ;;  %v446_v37 = vld [vmem:[%s2460_s21 + $0x38] sm:$0xff] }
  0xfc   : > { %431 = vst.msk [vmem:[%s2460_s21 + $0x48] sm:$0xff] %vm421_vm3, %v386_v54  ;;  %v569_v56 = vpop.f32.mrf.mxu1 }
  0xfd   : > { %v637_v57 = vadd.f32 %v569_v56, %v440_v55  ;;  %v1887_v58 = vpop.f32.mrf.mxu0 }
  0xfe   : > { %v1909_v59 = vpop.f32.mrf.mxu1 }
  0xff   : > { %654 = vst.msk [vmem:[%s2460_s21 + $0x8] sm:$0xff] %vm421_vm3, %v637_v57  ;;  %v797_v60 = vpop.f32.mrf.mxu0  ;;  %v447_v45 = vld [vmem:[%s2460_s21 + $0x40] sm:$0xff] }
 0x100   : > { %v574_v62 = vpop.f32.mrf.mxu1 }
 0x101   : > { %v638_v63 = vadd.f32 %v574_v62, %v441_v61  ;;  %v1946_v0 = vpop.f32.mrf.mxu0  ;;  %v449_v61 = vld [vmem:[%s2460_s21 + $0x50] sm:$0xff] }
 0x102   : > { %v670_v2 = vld [vmem:[%s2460_s21] sm:$0xff]  ;;  %v1912_v3 = vpop.f32.mrf.mxu1 }
 0x103   : > { %655 = vst.msk [vmem:[%s2460_s21 + $0x10] sm:$0xff] %vm421_vm3, %v638_v63  ;;  %v867_v4 = vadd.f32 %v797_v60, %v670_v2  ;;  %v800_v5 = vpop.f32.mrf.mxu0  ;;  %v448_v53 = vld [vmem:[%s2460_s21 + $0x48] sm:$0xff] }
 0x104   : > { %v577_v7 = vpop.f32.mrf.mxu1 }
 0x105   : > { %884 = vst.msk [vmem:[%s2460_s21] sm:$0xff] %vm421_vm3, %v867_v4  ;;  %v639_v8 = vadd.f32 %v577_v7, %v442_v6  ;;  %v1947_v9 = vpop.f32.mrf.mxu0  ;;  %v450_v6 = vld [vmem:[%s2460_s21 + $0x58] sm:$0xff] }
 0x106   : > { %v671_v10 = vld [vmem:[%s2460_s21 + $0x8] sm:$0xff]  ;;  %v1913_v11 = vpop.f32.mrf.mxu1 }
 0x107   : > { %656 = vst.msk [vmem:[%s2460_s21 + $0x18] sm:$0xff] %vm421_vm3, %v639_v8  ;;  %v868_v12 = vadd.f32 %v800_v5, %v671_v10  ;;  %v805_v13 = vpop.f32.mrf.mxu0 }
 0x108   : > { %v582_v15 = vpop.f32.mrf.mxu1 }
 0x109   : > { %885 = vst.msk [vmem:[%s2460_s21 + $0x8] sm:$0xff] %vm421_vm3, %v868_v12  ;;  %v640_v16 = vadd.f32 %v582_v15, %v443_v14  ;;  %v1950_v1 = vpop.f32.mrf.mxu0  ;;  %v451_v14 = vld [vmem:[%s2460_s21 + $0x60] sm:$0xff] }
 0x10a   : > { %v672_v17 = vld [vmem:[%s2460_s21 + $0x10] sm:$0xff]  ;;  %v1916_v18 = vpop.f32.mrf.mxu1 }
 0x10b   : > { %657 = vst.msk [vmem:[%s2460_s21 + $0x20] sm:$0xff] %vm421_vm3, %v640_v16  ;;  %v869_v19 = vadd.f32 %v805_v13, %v672_v17  ;;  %v808_v20 = vpop.f32.mrf.mxu0 }
 0x10c   : > { %v585_v22 = vpop.f32.mrf.mxu1 }
 0x10d   : > { %886 = vst.msk [vmem:[%s2460_s21 + $0x10] sm:$0xff] %vm421_vm3, %v869_v19  ;;  %v641_v23 = vadd.f32 %v585_v22, %v444_v21  ;;  %v1951_v24 = vpop.f32.mrf.mxu0  ;;  %v452_v21 = vld [vmem:[%s2460_s21 + $0x68] sm:$0xff] }
 0x10e   : > { %v673_v25 = vld [vmem:[%s2460_s21 + $0x18] sm:$0xff]  ;;  %v1917_v26 = vpop.f32.mrf.mxu1 }
 0x10f   : > { %658 = vst.msk [vmem:[%s2460_s21 + $0x28] sm:$0xff] %vm421_vm3, %v641_v23  ;;  %v870_v27 = vadd.f32 %v808_v20, %v673_v25  ;;  %v813_v28 = vpop.f32.mrf.mxu0 }
 0x110   : > { %v590_v30 = vpop.f32.mrf.mxu1 }
 0x111   : > { %887 = vst.msk [vmem:[%s2460_s21 + $0x18] sm:$0xff] %vm421_vm3, %v870_v27  ;;  %v642_v31 = vadd.f32 %v590_v30, %v445_v29  ;;  %v1954_v32 = vpop.f32.mrf.mxu0  ;;  %v453_v29 = vld [vmem:[%s2460_s21 + $0x70] sm:$0xff] }
 0x112   : > { %v674_v33 = vld [vmem:[%s2460_s21 + $0x20] sm:$0xff]  ;;  %v1920_v34 = vpop.f32.mrf.mxu1 }
 0x113   : > { %659 = vst.msk [vmem:[%s2460_s21 + $0x30] sm:$0xff] %vm421_vm3, %v642_v31  ;;  %v871_v35 = vadd.f32 %v813_v28, %v674_v33  ;;  %v816_v36 = vpop.f32.mrf.mxu0 }
 0x114   : > { %v593_v38 = vpop.f32.mrf.mxu1 }
 0x115   : > { %888 = vst.msk [vmem:[%s2460_s21 + $0x20] sm:$0xff] %vm421_vm3, %v871_v35  ;;  %v643_v39 = vadd.f32 %v593_v38, %v446_v37  ;;  %v1955_v40 = vpop.f32.mrf.mxu0  ;;  %v454_v37 = vld [vmem:[%s2460_s21 + $0x78] sm:$0xff] }
 0x116   : > { %v675_v41 = vld [vmem:[%s2460_s21 + $0x28] sm:$0xff]  ;;  %v1921_v42 = vpop.f32.mrf.mxu1 }
 0x117   : > { %660 = vst.msk [vmem:[%s2460_s21 + $0x38] sm:$0xff] %vm421_vm3, %v643_v39  ;;  %v872_v43 = vadd.f32 %v816_v36, %v675_v41  ;;  %v821_v44 = vpop.f32.mrf.mxu0 }
 0x118   : > { %v598_v46 = vpop.f32.mrf.mxu1 }
 0x119   : > { %889 = vst.msk [vmem:[%s2460_s21 + $0x28] sm:$0xff] %vm421_vm3, %v872_v43  ;;  %v644_v47 = vadd.f32 %v598_v46, %v447_v45  ;;  %v1958_v48 = vpop.f32.mrf.mxu0  ;;  %v455_v45 = vld [vmem:[%s2460_s21 + $0x80] sm:$0xff] }
 0x11a   : > { %v676_v49 = vld [vmem:[%s2460_s21 + $0x30] sm:$0xff]  ;;  %v1924_v50 = vpop.f32.mrf.mxu1 }
 0x11b   : > { %661 = vst.msk [vmem:[%s2460_s21 + $0x40] sm:$0xff] %vm421_vm3, %v644_v47  ;;  %v873_v51 = vadd.f32 %v821_v44, %v676_v49  ;;  %v824_v52 = vpop.f32.mrf.mxu0 }
 0x11c   : > { %v601_v54 = vpop.f32.mrf.mxu1 }
 0x11d   : > { %890 = vst.msk [vmem:[%s2460_s21 + $0x30] sm:$0xff] %vm421_vm3, %v873_v51  ;;  %v645_v55 = vadd.f32 %v601_v54, %v448_v53  ;;  %v1959_v56 = vpop.f32.mrf.mxu0 }
 0x11e   : > { %v677_v57 = vld [vmem:[%s2460_s21 + $0x38] sm:$0xff]  ;;  %v1925_v58 = vpop.f32.mrf.mxu1 }
 0x11f   : > { %662 = vst.msk [vmem:[%s2460_s21 + $0x48] sm:$0xff] %vm421_vm3, %v645_v55  ;;  %v874_v59 = vadd.f32 %v824_v52, %v677_v57  ;;  %v829_v60 = vpop.f32.mrf.mxu0 }
 0x120   : > { %v606_v62 = vpop.f32.mrf.mxu1 }
 0x121   : > { %891 = vst.msk [vmem:[%s2460_s21 + $0x38] sm:$0xff] %vm421_vm3, %v874_v59  ;;  %v646_v63 = vadd.f32 %v606_v62, %v449_v61  ;;  %v1962_v0 = vpop.f32.mrf.mxu0  ;;  %v901_v59 = vld [vmem:[%s2460_s21] sm:$0xff] }
 0x122   : > { %v678_v2 = vld [vmem:[%s2460_s21 + $0x40] sm:$0xff]  ;;  %v1928_v3 = vpop.f32.mrf.mxu1 }
 0x123   : > { %663 = vst.msk [vmem:[%s2460_s21 + $0x50] sm:$0xff] %vm421_vm3, %v646_v63  ;;  %v875_v4 = vadd.f32 %v829_v60, %v678_v2  ;;  %v832_v5 = vpop.f32.mrf.mxu0 }
 0x124   : > { %v609_v7 = vpop.f32.mrf.mxu1 }
 0x125   : > { %892 = vst.msk [vmem:[%s2460_s21 + $0x40] sm:$0xff] %vm421_vm3, %v875_v4  ;;  %v647_v8 = vadd.f32 %v609_v7, %v450_v6  ;;  %v1963_v9 = vpop.f32.mrf.mxu0  ;;  %v902_v4 = vld [vmem:[%s2460_s21 + $0x8] sm:$0xff] }
 0x126   : > { %v679_v10 = vld [vmem:[%s2460_s21 + $0x48] sm:$0xff]  ;;  %v1929_v11 = vpop.f32.mrf.mxu1 }
 0x127   : > { %664 = vst.msk [vmem:[%s2460_s21 + $0x58] sm:$0xff] %vm421_vm3, %v647_v8  ;;  %v876_v12 = vadd.f32 %v832_v5, %v679_v10  ;;  %v837_v13 = vpop.f32.mrf.mxu0  ;;  %v903_v10 = vld [vmem:[%s2460_s21 + $0x10] sm:$0xff] }
 0x128   : > { %v614_v15 = vpop.f32.mrf.mxu1 }
 0x129   : > { %893 = vst.msk [vmem:[%s2460_s21 + $0x48] sm:$0xff] %vm421_vm3, %v876_v12  ;;  %v648_v16 = vadd.f32 %v614_v15, %v451_v14  ;;  %v1966_v1 = vpop.f32.mrf.mxu0 }
 0x12a   : > { %v680_v17 = vld [vmem:[%s2460_s21 + $0x50] sm:$0xff]  ;;  %v1932_v18 = vpop.f32.mrf.mxu1 }
 0x12b   : > { %665 = vst.msk [vmem:[%s2460_s21 + $0x60] sm:$0xff] %vm421_vm3, %v648_v16  ;;  %v877_v19 = vadd.f32 %v837_v13, %v680_v17  ;;  %v840_v20 = vpop.f32.mrf.mxu0  ;;  %v904_v17 = vld [vmem:[%s2460_s21 + $0x18] sm:$0xff] }
 0x12c   : > { %v617_v22 = vpop.f32.mrf.mxu1 }
 0x12d   : > { %894 = vst.msk [vmem:[%s2460_s21 + $0x50] sm:$0xff] %vm421_vm3, %v877_v19  ;;  %v649_v23 = vadd.f32 %v617_v22, %v452_v21  ;;  %v1967_v24 = vpop.f32.mrf.mxu0 }
 0x12e   : > { %v681_v25 = vld [vmem:[%s2460_s21 + $0x58] sm:$0xff]  ;;  %v1933_v26 = vpop.f32.mrf.mxu1 }
 0x12f   : > { %666 = vst.msk [vmem:[%s2460_s21 + $0x68] sm:$0xff] %vm421_vm3, %v649_v23  ;;  %v878_v27 = vadd.f32 %v840_v20, %v681_v25  ;;  %v845_v28 = vpop.f32.mrf.mxu0  ;;  %v905_v25 = vld [vmem:[%s2460_s21 + $0x20] sm:$0xff] }
 0x130   : > { %v622_v30 = vpop.f32.mrf.mxu1 }
 0x131   : > { %895 = vst.msk [vmem:[%s2460_s21 + $0x58] sm:$0xff] %vm421_vm3, %v878_v27  ;;  %v650_v31 = vadd.f32 %v622_v30, %v453_v29  ;;  %v1970_v32 = vpop.f32.mrf.mxu0  ;;  %v2620_v29 = vld [vmem:[%s2790_s2] ss:$0 sm:$0xff] }
 0x132   : > { %v682_v33 = vld [vmem:[%s2460_s21 + $0x60] sm:$0xff]  ;;  %v1936_v34 = vpop.f32.mrf.mxu1 }
 0x133   : > { %667 = vst.msk [vmem:[%s2460_s21 + $0x70] sm:$0xff] %vm421_vm3, %v650_v31  ;;  %v879_v35 = vadd.f32 %v845_v28, %v682_v33  ;;  %v848_v36 = vpop.f32.mrf.mxu0 }
 0x134   : > { %v625_v38 = vpop.f32.mrf.mxu1 }
 0x135   : > { %896 = vst.msk [vmem:[%s2460_s21 + $0x60] sm:$0xff] %vm421_vm3, %v879_v35  ;;  %v651_v39 = vadd.f32 %v625_v38, %v454_v37  ;;  %v1971_v40 = vpop.f32.mrf.mxu0  ;;  %v906_v35 = vld [vmem:[%s2460_s21 + $0x28] sm:$0xff] }
 0x136   : > { %v683_v41 = vld [vmem:[%s2460_s21 + $0x68] sm:$0xff]  ;;  %v1937_v42 = vpop.f32.mrf.mxu1 }
 0x137   : > { %668 = vst.msk [vmem:[%s2460_s21 + $0x78] sm:$0xff] %vm421_vm3, %v651_v39  ;;  %v880_v43 = vadd.f32 %v848_v36, %v683_v41  ;;  %v853_v44 = vpop.f32.mrf.mxu0 }
 0x138   : > { %v630_v46 = vpop.f32.mrf.mxu1 }
 0x139   : > { %897 = vst.msk [vmem:[%s2460_s21 + $0x68] sm:$0xff] %vm421_vm3, %v880_v43  ;;  %v652_v47 = vadd.f32 %v630_v46, %v455_v45  ;;  %v1974_v48 = vpop.f32.mrf.mxu0  ;;  %v907_v46 = vld [vmem:[%s2460_s21 + $0x30] sm:$0xff] }
 0x13a   : > { %v684_v49 = vld [vmem:[%s2460_s21 + $0x70] sm:$0xff]  ;;  %v1940_v50 = vpop.f32.mrf.mxu1 }
 0x13b   : > { %669 = vst.msk [vmem:[%s2460_s21 + $0x80] sm:$0xff] %vm421_vm3, %v652_v47  ;;  %v881_v51 = vadd.f32 %v853_v44, %v684_v49  ;;  %v856_v52 = vpop.f32.mrf.mxu0 }
 0x13c   : > { %v633_v53 = vpop.f32.mrf.mxu1 }
 0x13d   : > { %898 = vst.msk [vmem:[%s2460_s21 + $0x70] sm:$0xff] %vm421_vm3, %v881_v51  ;;  %v1975_v54 = vpop.f32.mrf.mxu0 }
 0x13e   : > { %v685_v55 = vld [vmem:[%s2460_s21 + $0x78] sm:$0xff]  ;;  %v1941_v56 = vpop.f32.mrf.mxu1 }
 0x13f   : > { %v882_v57 = vadd.f32 %v856_v52, %v685_v55  ;;  %v861_v58 = vpop.f32.mrf.mxu0 }
 0x140   : > { %v1028_v60 = vpop.f32.mrf.mxu1 }
 0x141   : > { %899 = vst.msk [vmem:[%s2460_s21 + $0x78] sm:$0xff] %vm421_vm3, %v882_v57  ;;  %v1098_v61 = vadd.f32 %v1028_v60, %v901_v59  ;;  %v1978_v62 = vpop.f32.mrf.mxu0 }
 0x142   : > { %v686_v63 = vld [vmem:[%s2460_s21 + $0x80] sm:$0xff]  ;;  %v1984_v0 = vpop.f32.mrf.mxu1 }
 0x143   : > { %v883_v2 = vadd.f32 %v861_v58, %v686_v63  ;;  %1115 = vst.msk [vmem:[%s2460_s21] sm:$0xff] %vm421_vm3, %v1098_v61  ;;  %v864_v3 = vpop.f32.mrf.mxu0  ;;  %v908_v58 = vld [vmem:[%s2460_s21 + $0x38] sm:$0xff] }
 0x144   : > { %v1031_v5 = vpop.f32.mrf.mxu1 }
 0x145   : > { %900 = vst.msk [vmem:[%s2460_s21 + $0x80] sm:$0xff] %vm421_vm3, %v883_v2  ;;  %v1099_v6 = vadd.f32 %v1031_v5, %v902_v4  ;;  %v1979_v7 = vpop.f32.mrf.mxu0 }
 0x146   : > { %v1985_v8 = vpop.f32.mrf.mxu1  ;;  %v909_v7 = vld [vmem:[%s2460_s21 + $0x40] sm:$0xff] }
 0x147   : > { %1116 = vst.msk [vmem:[%s2460_s21 + $0x8] sm:$0xff] %vm421_vm3, %v1099_v6  ;;  %v1259_v9 = vpop.f32.mrf.mxu0 }
 0x148   : > { %v1036_v11 = vpop.f32.mrf.mxu1 }
 0x149   : > { %v1100_v12 = vadd.f32 %v1036_v11, %v903_v10  ;;  %v2022_v13 = vpop.f32.mrf.mxu0 }
 0x14a   : > { %v1132_v14 = vld [vmem:[%s2460_s21] sm:$0xff]  ;;  %v1988_v15 = vpop.f32.mrf.mxu1 }
 0x14b   : > { %1117 = vst.msk [vmem:[%s2460_s21 + $0x10] sm:$0xff] %vm421_vm3, %v1100_v12  ;;  %v1329_v16 = vadd.f32 %v1259_v9, %v1132_v14  ;;  %v1262_v1 = vpop.f32.mrf.mxu0 }
 0x14c   : > { %v1039_v18 = vpop.f32.mrf.mxu1 }
 0x14d   : > { %1346 = vst.msk [vmem:[%s2460_s21] sm:$0xff] %vm421_vm3, %v1329_v16  ;;  %v1101_v19 = vadd.f32 %v1039_v18, %v904_v17  ;;  %v2023_v20 = vpop.f32.mrf.mxu0  ;;  %v910_v18 = vld [vmem:[%s2460_s21 + $0x48] sm:$0xff] }
 0x14e   : > { %v1133_v21 = vld [vmem:[%s2460_s21 + $0x8] sm:$0xff]  ;;  %v1989_v22 = vpop.f32.mrf.mxu1 }
 0x14f   : > { %1118 = vst.msk [vmem:[%s2460_s21 + $0x18] sm:$0xff] %vm421_vm3, %v1101_v19  ;;  %v1330_v23 = vadd.f32 %v1262_v1, %v1133_v21  ;;  %v1267_v24 = vpop.f32.mrf.mxu0 }
 0x150   : > { %v1044_v26 = vpop.f32.mrf.mxu1 }
 0x151   : > { %1347 = vst.msk [vmem:[%s2460_s21 + $0x8] sm:$0xff] %vm421_vm3, %v1330_v23  ;;  %v1102_v27 = vadd.f32 %v1044_v26, %v905_v25  ;;  %v2026_v28 = vpop.f32.mrf.mxu0 }
 0x152   : > { %v1134_v30 = vld [vmem:[%s2460_s21 + $0x10] sm:$0xff]  ;;  %v1992_v31 = vpop.f32.mrf.mxu1 }
 0x153   : > { %1119 = vst.msk [vmem:[%s2460_s21 + $0x20] sm:$0xff] %vm421_vm3, %v1102_v27  ;;  %v1331_v32 = vadd.f32 %v1267_v24, %v1134_v30  ;;  %v1270_v33 = vpop.f32.mrf.mxu0  ;;  %v911_v31 = vld [vmem:[%s2460_s21 + $0x50] sm:$0xff] }
 0x154   : > { %v1363_v34 = vld [vmem:[%s2460_s21] sm:$0xff]  ;;  %v1047_v36 = vpop.f32.mrf.mxu1 }
 0x155   : > { %v1387_v37 = vadd.f32 %v2620_v29, %v1363_v34  ;;  %1348 = vst.msk [vmem:[%s2460_s21 + $0x10] sm:$0xff] %vm421_vm3, %v1331_v32  ;;  %v1103_v38 = vadd.f32 %v1047_v36, %v906_v35  ;;  %v2027_v39 = vpop.f32.mrf.mxu0 }
 0x156   : > { %v1135_v40 = vld [vmem:[%s2460_s21 + $0x18] sm:$0xff]  ;;  %v1993_v41 = vpop.f32.mrf.mxu1 }
 0x157   : > { %vm1404_vm4 = vcmp.ge.f32.partialorder %v1387_v37, 0.0  ;;  %v1421_v42 = vmul.f32 0.1, %v1387_v37  ;;  %1120 = vst.msk [vmem:[%s2460_s21 + $0x28] sm:$0xff] %vm421_vm3, %v1103_v38  ;;  %v1332_v43 = vadd.f32 %v1270_v33, %v1135_v40  ;;  %v1275_v44 = vpop.f32.mrf.mxu0 }
 0x158   : > { %v1364_v45 = vld [vmem:[%s2460_s21 + $0x8] sm:$0xff]  ;;  %v1052_v47 = vpop.f32.mrf.mxu1 }
 0x159   : > { %v1438_v48 = vsel %vm1404_vm4, %v1387_v37, %v1421_v42  ;;  %v1388_v49 = vadd.f32 %v2620_v29, %v1364_v45  ;;  %1349 = vst.msk [vmem:[%s2460_s21 + $0x18] sm:$0xff] %vm421_vm3, %v1332_v43  ;;  %v1104_v50 = vadd.f32 %v1052_v47, %v907_v46  ;;  %v2030_v51 = vpop.f32.mrf.mxu0  ;;  %v912_v43 = vld [vmem:[%s2460_s21 + $0x58] sm:$0xff] }
 0x15a   : > { %1455 = vst.msk [vmem:[%s2460_s21] sm:$0xff] %vm421_vm3, %v1438_v48  ;;  %v1136_v52 = vld [vmem:[%s2460_s21 + $0x20] sm:$0xff]  ;;  %v1996_v53 = vpop.f32.mrf.mxu1 }
 0x15b   : > { %vm1405_vm5 = vcmp.ge.f32.partialorder %v1388_v49, 0.0  ;;  %v1422_v54 = vmul.f32 0.1, %v1388_v49  ;;  %1121 = vst.msk [vmem:[%s2460_s21 + $0x30] sm:$0xff] %vm421_vm3, %v1104_v50  ;;  %v1333_v55 = vadd.f32 %v1275_v44, %v1136_v52  ;;  %v1278_v56 = vpop.f32.mrf.mxu0 }
 0x15c   : > { %v1365_v57 = vld [vmem:[%s2460_s21 + $0x10] sm:$0xff]  ;;  %v1055_v59 = vpop.f32.mrf.mxu1 }
 0x15d   : > { %v1439_v60 = vsel %vm1405_vm5, %v1388_v49, %v1422_v54  ;;  %v1389_v61 = vadd.f32 %v2620_v29, %v1365_v57  ;;  %1350 = vst.msk [vmem:[%s2460_s21 + $0x20] sm:$0xff] %vm421_vm3, %v1333_v55  ;;  %v1105_v62 = vadd.f32 %v1055_v59, %v908_v58  ;;  %v2031_v63 = vpop.f32.mrf.mxu0  ;;  %v913_v55 = vld [vmem:[%s2460_s21 + $0x60] sm:$0xff] }
 0x15e   : > { %1456 = vst.msk [vmem:[%s2460_s21 + $0x8] sm:$0xff] %vm421_vm3, %v1439_v60  ;;  %v1137_v0 = vld [vmem:[%s2460_s21 + $0x28] sm:$0xff]  ;;  %v1997_v2 = vpop.f32.mrf.mxu1 }
 0x15f   : > { %vm1406_vm6 = vcmp.ge.f32.partialorder %v1389_v61, 0.0  ;;  %v1423_v3 = vmul.f32 0.1, %v1389_v61  ;;  %1122 = vst.msk [vmem:[%s2460_s21 + $0x38] sm:$0xff] %vm421_vm3, %v1105_v62  ;;  %v1334_v4 = vadd.f32 %v1278_v56, %v1137_v0  ;;  %v1283_v5 = vpop.f32.mrf.mxu0 }
 0x160   : > { %v1366_v6 = vld [vmem:[%s2460_s21 + $0x18] sm:$0xff]  ;;  %v1060_v8 = vpop.f32.mrf.mxu1 }
 0x161   : > { %v1440_v9 = vsel %vm1406_vm6, %v1389_v61, %v1423_v3  ;;  %v1390_v10 = vadd.f32 %v2620_v29, %v1366_v6  ;;  %1351 = vst.msk [vmem:[%s2460_s21 + $0x28] sm:$0xff] %vm421_vm3, %v1334_v4  ;;  %v1106_v11 = vadd.f32 %v1060_v8, %v909_v7  ;;  %v2034_v12 = vpop.f32.mrf.mxu0  ;;  %v914_v4 = vld [vmem:[%s2460_s21 + $0x68] sm:$0xff] }
 0x162   : > { %1457 = vst.msk [vmem:[%s2460_s21 + $0x10] sm:$0xff] %vm421_vm3, %v1440_v9  ;;  %v1138_v13 = vld [vmem:[%s2460_s21 + $0x30] sm:$0xff]  ;;  %v2000_v14 = vpop.f32.mrf.mxu1 }
 0x163   : > { %vm1407_vm7 = vcmp.ge.f32.partialorder %v1390_v10, 0.0  ;;  %v1424_v15 = vmul.f32 0.1, %v1390_v10  ;;  %1123 = vst.msk [vmem:[%s2460_s21 + $0x40] sm:$0xff] %vm421_vm3, %v1106_v11  ;;  %v1335_v16 = vadd.f32 %v1283_v5, %v1138_v13  ;;  %v1286_v1 = vpop.f32.mrf.mxu0 }
 0x164   : > { %v1367_v17 = vld [vmem:[%s2460_s21 + $0x20] sm:$0xff]  ;;  %v1063_v19 = vpop.f32.mrf.mxu1 }
 0x165   : > { %v1441_v20 = vsel %vm1407_vm7, %v1390_v10, %v1424_v15  ;;  %v1391_v21 = vadd.f32 %v2620_v29, %v1367_v17  ;;  %1352 = vst.msk [vmem:[%s2460_s21 + $0x30] sm:$0xff] %vm421_vm3, %v1335_v16  ;;  %v1107_v22 = vadd.f32 %v1063_v19, %v910_v18  ;;  %v2035_v23 = vpop.f32.mrf.mxu0  ;;  %v915_v16 = vld [vmem:[%s2460_s21 + $0x70] sm:$0xff] }
 0x166   : > { %1458 = vst.msk [vmem:[%s2460_s21 + $0x18] sm:$0xff] %vm421_vm3, %v1441_v20  ;;  %v1139_v24 = vld [vmem:[%s2460_s21 + $0x38] sm:$0xff]  ;;  %v2001_v25 = vpop.f32.mrf.mxu1 }
 0x167   : > { %vm1408_vm8 = vcmp.ge.f32.partialorder %v1391_v21, 0.0  ;;  %v1425_v26 = vmul.f32 0.1, %v1391_v21  ;;  %1124 = vst.msk [vmem:[%s2460_s21 + $0x48] sm:$0xff] %vm421_vm3, %v1107_v22  ;;  %v1336_v27 = vadd.f32 %v1286_v1, %v1139_v24  ;;  %v1291_v28 = vpop.f32.mrf.mxu0 }
 0x168   : > { %v1368_v30 = vld [vmem:[%s2460_s21 + $0x28] sm:$0xff]  ;;  %v1068_v32 = vpop.f32.mrf.mxu1 }
 0x169   : > { %v1442_v33 = vsel %vm1408_vm8, %v1391_v21, %v1425_v26  ;;  %v1392_v34 = vadd.f32 %v2620_v29, %v1368_v30  ;;  %1353 = vst.msk [vmem:[%s2460_s21 + $0x38] sm:$0xff] %vm421_vm3, %v1336_v27  ;;  %v1108_v35 = vadd.f32 %v1068_v32, %v911_v31  ;;  %v2038_v36 = vpop.f32.mrf.mxu0  ;;  %v916_v27 = vld [vmem:[%s2460_s21 + $0x78] sm:$0xff] }
 0x16a   : > { %1459 = vst.msk [vmem:[%s2460_s21 + $0x20] sm:$0xff] %vm421_vm3, %v1442_v33  ;;  %v1140_v37 = vld [vmem:[%s2460_s21 + $0x40] sm:$0xff]  ;;  %v2004_v38 = vpop.f32.mrf.mxu1 }
 0x16b   : > { %vm1409_vm9 = vcmp.ge.f32.partialorder %v1392_v34, 0.0  ;;  %v1426_v39 = vmul.f32 0.1, %v1392_v34  ;;  %1125 = vst.msk [vmem:[%s2460_s21 + $0x50] sm:$0xff] %vm421_vm3, %v1108_v35  ;;  %v1337_v40 = vadd.f32 %v1291_v28, %v1140_v37  ;;  %v1294_v41 = vpop.f32.mrf.mxu0 }
 0x16c   : > { %v1369_v42 = vld [vmem:[%s2460_s21 + $0x30] sm:$0xff]  ;;  %v1071_v44 = vpop.f32.mrf.mxu1 }
 0x16d   : > { %v1443_v45 = vsel %vm1409_vm9, %v1392_v34, %v1426_v39  ;;  %v1393_v46 = vadd.f32 %v2620_v29, %v1369_v42  ;;  %1354 = vst.msk [vmem:[%s2460_s21 + $0x40] sm:$0xff] %vm421_vm3, %v1337_v40  ;;  %v1109_v47 = vadd.f32 %v1071_v44, %v912_v43  ;;  %v2039_v48 = vpop.f32.mrf.mxu0  ;;  %v917_v40 = vld [vmem:[%s2460_s21 + $0x80] sm:$0xff] }
 0x16e   : > { %1460 = vst.msk [vmem:[%s2460_s21 + $0x28] sm:$0xff] %vm421_vm3, %v1443_v45  ;;  %v1141_v49 = vld [vmem:[%s2460_s21 + $0x48] sm:$0xff]  ;;  %v2005_v50 = vpop.f32.mrf.mxu1 }
 0x16f   : > { %vm1410_vm10 = vcmp.ge.f32.partialorder %v1393_v46, 0.0  ;;  %v1427_v51 = vmul.f32 0.1, %v1393_v46  ;;  %1126 = vst.msk [vmem:[%s2460_s21 + $0x58] sm:$0xff] %vm421_vm3, %v1109_v47  ;;  %v1338_v52 = vadd.f32 %v1294_v41, %v1141_v49  ;;  %v1299_v53 = vpop.f32.mrf.mxu0 }
 0x170   : > { %v1370_v54 = vld [vmem:[%s2460_s21 + $0x38] sm:$0xff]  ;;  %v1076_v56 = vpop.f32.mrf.mxu1 }
 0x171   : > { %v1444_v57 = vsel %vm1410_vm10, %v1393_v46, %v1427_v51  ;;  %v1394_v58 = vadd.f32 %v2620_v29, %v1370_v54  ;;  %1355 = vst.msk [vmem:[%s2460_s21 + $0x48] sm:$0xff] %vm421_vm3, %v1338_v52  ;;  %v1110_v59 = vadd.f32 %v1076_v56, %v913_v55  ;;  %v2042_v60 = vpop.f32.mrf.mxu0 }
 0x172   : > { %1461 = vst.msk [vmem:[%s2460_s21 + $0x30] sm:$0xff] %vm421_vm3, %v1444_v57  ;;  %v1142_v61 = vld [vmem:[%s2460_s21 + $0x50] sm:$0xff]  ;;  %v2008_v62 = vpop.f32.mrf.mxu1 }
 0x173   : > { %vm1411_vm11 = vcmp.ge.f32.partialorder %v1394_v58, 0.0  ;;  %v1428_v63 = vmul.f32 0.1, %v1394_v58  ;;  %1127 = vst.msk [vmem:[%s2460_s21 + $0x60] sm:$0xff] %vm421_vm3, %v1110_v59  ;;  %v1339_v0 = vadd.f32 %v1299_v53, %v1142_v61  ;;  %v1302_v2 = vpop.f32.mrf.mxu0 }
 0x174   : > { %v1371_v3 = vld [vmem:[%s2460_s21 + $0x40] sm:$0xff]  ;;  %v1079_v5 = vpop.f32.mrf.mxu1 }
 0x175   : > { %v1445_v6 = vsel %vm1411_vm11, %v1394_v58, %v1428_v63  ;;  %v1395_v7 = vadd.f32 %v2620_v29, %v1371_v3  ;;  %1356 = vst.msk [vmem:[%s2460_s21 + $0x50] sm:$0xff] %vm421_vm3, %v1339_v0  ;;  %v1111_v8 = vadd.f32 %v1079_v5, %v914_v4  ;;  %v2043_v9 = vpop.f32.mrf.mxu0 }
 0x176   : > { %1462 = vst.msk [vmem:[%s2460_s21 + $0x38] sm:$0xff] %vm421_vm3, %v1445_v6  ;;  %v1143_v10 = vld [vmem:[%s2460_s21 + $0x58] sm:$0xff]  ;;  %v2009_v11 = vpop.f32.mrf.mxu1 }
 0x177   : > { %vm1412_vm12 = vcmp.ge.f32.partialorder %v1395_v7, 0.0  ;;  %v1429_v12 = vmul.f32 0.1, %v1395_v7  ;;  %1128 = vst.msk [vmem:[%s2460_s21 + $0x68] sm:$0xff] %vm421_vm3, %v1111_v8  ;;  %v1340_v13 = vadd.f32 %v1302_v2, %v1143_v10  ;;  %v1307_v14 = vpop.f32.mrf.mxu0 }
 0x178   : > { %v1372_v15 = vld [vmem:[%s2460_s21 + $0x48] sm:$0xff]  ;;  %v1084_v1 = vpop.f32.mrf.mxu1 }
 0x179   : > { %v1446_v17 = vsel %vm1412_vm12, %v1395_v7, %v1429_v12  ;;  %v1396_v18 = vadd.f32 %v2620_v29, %v1372_v15  ;;  %1357 = vst.msk [vmem:[%s2460_s21 + $0x58] sm:$0xff] %vm421_vm3, %v1340_v13  ;;  %v1112_v19 = vadd.f32 %v1084_v1, %v915_v16  ;;  %v2046_v20 = vpop.f32.mrf.mxu0 }
 0x17a   : > { %1463 = vst.msk [vmem:[%s2460_s21 + $0x40] sm:$0xff] %vm421_vm3, %v1446_v17  ;;  %v1144_v21 = vld [vmem:[%s2460_s21 + $0x60] sm:$0xff]  ;;  %v2012_v22 = vpop.f32.mrf.mxu1 }
 0x17b   : > { %vm1413_vm13 = vcmp.ge.f32.partialorder %v1396_v18, 0.0  ;;  %v1430_v23 = vmul.f32 0.1, %v1396_v18  ;;  %1129 = vst.msk [vmem:[%s2460_s21 + $0x70] sm:$0xff] %vm421_vm3, %v1112_v19  ;;  %v1341_v24 = vadd.f32 %v1307_v14, %v1144_v21  ;;  %v1310_v25 = vpop.f32.mrf.mxu0 }
 0x17c   : > { %v1373_v26 = vld [vmem:[%s2460_s21 + $0x50] sm:$0xff]  ;;  %v1087_v28 = vpop.f32.mrf.mxu1 }
 0x17d   : > { %v1447_v30 = vsel %vm1413_vm13, %v1396_v18, %v1430_v23  ;;  %v1397_v31 = vadd.f32 %v2620_v29, %v1373_v26  ;;  %1358 = vst.msk [vmem:[%s2460_s21 + $0x60] sm:$0xff] %vm421_vm3, %v1341_v24  ;;  %v1113_v32 = vadd.f32 %v1087_v28, %v916_v27  ;;  %v2047_v33 = vpop.f32.mrf.mxu0 }
 0x17e   : > { %1464 = vst.msk [vmem:[%s2460_s21 + $0x48] sm:$0xff] %vm421_vm3, %v1447_v30  ;;  %v1145_v34 = vld [vmem:[%s2460_s21 + $0x68] sm:$0xff]  ;;  %v2013_v35 = vpop.f32.mrf.mxu1 }
 0x17f   : > { %vm1414_vm14 = vcmp.ge.f32.partialorder %v1397_v31, 0.0  ;;  %v1431_v36 = vmul.f32 0.1, %v1397_v31  ;;  %1130 = vst.msk [vmem:[%s2460_s21 + $0x78] sm:$0xff] %vm421_vm3, %v1113_v32  ;;  %v1342_v37 = vadd.f32 %v1310_v25, %v1145_v34  ;;  %v1315_v38 = vpop.f32.mrf.mxu0 }
 0x180   : > { %v1374_v39 = vld [vmem:[%s2460_s21 + $0x58] sm:$0xff]  ;;  %v1092_v41 = vpop.f32.mrf.mxu1 }
 0x181   : > { %v1448_v42 = vsel %vm1414_vm14, %v1397_v31, %v1431_v36  ;;  %v1398_v43 = vadd.f32 %v2620_v29, %v1374_v39  ;;  %1359 = vst.msk [vmem:[%s2460_s21 + $0x68] sm:$0xff] %vm421_vm3, %v1342_v37  ;;  %v1114_v44 = vadd.f32 %v1092_v41, %v917_v40  ;;  %v2050_v45 = vpop.f32.mrf.mxu0 }
 0x182   : > { %1465 = vst.msk [vmem:[%s2460_s21 + $0x50] sm:$0xff] %vm421_vm3, %v1448_v42  ;;  %v1146_v46 = vld [vmem:[%s2460_s21 + $0x70] sm:$0xff]  ;;  %v2016_v47 = vpop.f32.mrf.mxu1 }
 0x183   : > { %vm1415_vm15 = vcmp.ge.f32.partialorder %v1398_v43, 0.0  ;;  %v1432_v48 = vmul.f32 0.1, %v1398_v43  ;;  %1131 = vst.msk [vmem:[%s2460_s21 + $0x80] sm:$0xff] %vm421_vm3, %v1114_v44  ;;  %v1343_v49 = vadd.f32 %v1315_v38, %v1146_v46  ;;  %v1318_v50 = vpop.f32.mrf.mxu0 }
 0x184   : > { %v1375_v51 = vld [vmem:[%s2460_s21 + $0x60] sm:$0xff]  ;;  %v1095_v52 = vpop.f32.mrf.mxu1 }
 0x185   : > { %v1449_v53 = vsel %vm1415_vm15, %v1398_v43, %v1432_v48  ;;  %v1399_v54 = vadd.f32 %v2620_v29, %v1375_v51  ;;  %1360 = vst.msk [vmem:[%s2460_s21 + $0x70] sm:$0xff] %vm421_vm3, %v1343_v49  ;;  %v2051_v55 = vpop.f32.mrf.mxu0 }
 0x186   : > { %1466 = vst.msk [vmem:[%s2460_s21 + $0x58] sm:$0xff] %vm421_vm3, %v1449_v53  ;;  %v1147_v56 = vld [vmem:[%s2460_s21 + $0x78] sm:$0xff]  ;;  %v2017_v57 = vpop.f32.mrf.mxu1 }
 0x187   : > { %vm1416_vm0 = vcmp.ge.f32.partialorder %v1399_v54, 0.0  ;;  %v1433_v58 = vmul.f32 0.1, %v1399_v54  ;;  %v1344_v59 = vadd.f32 %v1318_v50, %v1147_v56  ;;  %v1323_v60 = vpop.f32.mrf.mxu0 }
 0x188   : > { %v1376_v61 = vld [vmem:[%s2460_s21 + $0x68] sm:$0xff] }
 0x189   : > { %v1450_v62 = vsel %vm1416_vm0, %v1399_v54, %v1433_v58  ;;  %v1400_v63 = vadd.f32 %v2620_v29, %v1376_v61  ;;  %1361 = vst.msk [vmem:[%s2460_s21 + $0x78] sm:$0xff] %vm421_vm3, %v1344_v59  ;;  %v2054_v0 = vpop.f32.mrf.mxu0 }
 0x18a   : > { %1467 = vst.msk [vmem:[%s2460_s21 + $0x60] sm:$0xff] %vm421_vm3, %v1450_v62  ;;  %v1148_v2 = vld [vmem:[%s2460_s21 + $0x80] sm:$0xff] }
 0x18b   : > { %vm1417_vm1 = vcmp.ge.f32.partialorder %v1400_v63, 0.0  ;;  %v1434_v3 = vmul.f32 0.1, %v1400_v63  ;;  %v1345_v4 = vadd.f32 %v1323_v60, %v1148_v2  ;;  %v1326_v5 = vpop.f32.mrf.mxu0 }
 0x18c   : > { %v1377_v6 = vld [vmem:[%s2460_s21 + $0x70] sm:$0xff] }
 0x18d   : > { %v1451_v7 = vsel %vm1417_vm1, %v1400_v63, %v1434_v3  ;;  %v1401_v8 = vadd.f32 %v2620_v29, %v1377_v6  ;;  %1362 = vst.msk [vmem:[%s2460_s21 + $0x80] sm:$0xff] %vm421_vm3, %v1345_v4  ;;  %v2055_v9 = vpop.f32.mrf.mxu0 }
 0x18e   : > { %1468 = vst.msk [vmem:[%s2460_s21 + $0x68] sm:$0xff] %vm421_vm3, %v1451_v7 }
 0x18f   : > { %vm1418_vm2 = vcmp.ge.f32.partialorder %v1401_v8, 0.0  ;;  %v1435_v10 = vmul.f32 0.1, %v1401_v8 }
 0x190   : > { %v1378_v11 = vld [vmem:[%s2460_s21 + $0x78] sm:$0xff] }
 0x191   : > { %v1452_v12 = vsel %vm1418_vm2, %v1401_v8, %v1435_v10  ;;  %v1402_v13 = vadd.f32 %v2620_v29, %v1378_v11 }
 0x192   : > { %1469 = vst.msk [vmem:[%s2460_s21 + $0x70] sm:$0xff] %vm421_vm3, %v1452_v12 }
 0x193   : > { %vm1419_vm4 = vcmp.ge.f32.partialorder %v1402_v13, 0.0  ;;  %v1436_v14 = vmul.f32 0.1, %v1402_v13 }
 0x194   : > { %v1379_v15 = vld [vmem:[%s2460_s21 + $0x80] sm:$0xff] }
 0x195   : > { %v1453_v16 = vsel %vm1419_vm4, %v1402_v13, %v1436_v14  ;;  %v1403_v1 = vadd.f32 %v2620_v29, %v1379_v15 }
 0x196   : > { %1470 = vst.msk [vmem:[%s2460_s21 + $0x78] sm:$0xff] %vm421_vm3, %v1453_v16 }
 0x197   : > { %vm1420_vm5 = vcmp.ge.f32.partialorder %v1403_v1, 0.0  ;;  %v1437_v17 = vmul.f32 0.1, %v1403_v1 }
 0x199   : > { %v1454_v18 = vsel %vm1420_vm5, %v1403_v1, %v1437_v17 }
 0x19a   : > { %1471 = vst.msk [vmem:[%s2460_s21 + $0x80] sm:$0xff] %vm421_vm3, %v1454_v18 }
 0x19b PF: > { %s13_s16 = sadd.s32 1, %s2141_s16   ;;  %s2792_s12 = smov %s2133_s14 }
 0x19c   : > { %p10_p7 = scmp.ge.s32.totalorder %s13_s16, 10   ;;  %s2793_s13 = smov %s2137_s15 }
 0x19d   : > { %s2794_s14 = smov %s2797_s17  ;;  %s2795_s15 = smov %s2801_s18 }
 0x19e   :  { %12 = sbr.rel (!%p10_p7) target bundleno = 3 (0x3), region = 157 }

</bundles_post_ra>
